<compile_context>
chip_gen: v7x
topology: tpu7x:2x2x1
jax: 0.10.0
libtpu: 0.0.40
codegen_flags: <defaults>
</compile_context>

<pallas_src>
import jax
import jax.numpy as jnp
import numpy as np
from jax import lax
from jax.experimental import pallas as pl
from jax.experimental.pallas import tpu as pltpu

EPS = 1e-5


def _resnet_block_kernel(x_ref, w1_ref, w2_ref, g1_ref, be1_ref, g2_ref, be2_ref,
                         gsum_ref, gbcast_ref, out_ref, pad_ref):
    # x_ref:      (N, H, W*C)    f32  input, channels folded into the lane dim
    # w*_ref:     (3, W*C, W*C)  bf16 banded conv weights (one band matrix per kh)
    # g*/be*_ref: (1, W*C)       f32  BN gamma/beta tiled across the W lane-groups
    # gsum_ref:   (W*C, C)       f32  0/1 matrix: sum the W lane-groups per channel
    # gbcast_ref: (C, W*C)       f32  0/1 matrix: broadcast per-channel back to lanes
    # out_ref:    (N, H, W*C)    f32
    # pad_ref:    VMEM (N, H+2, W*C) bf16 scratch (H-padded conv input)
    N, H, WC = x_ref.shape
    C = gsum_ref.shape[1]
    cnt = jnp.float32(N * H * (WC // C))

    def conv(w_ref):
        # 3x3 "same" conv as 3 banded MXU matmuls (W-taps folded into K).
        acc = jnp.zeros((N * H, WC), jnp.float32)
        for dh in range(3):
            patch = pad_ref[:, dh:dh + H, :].reshape(N * H, WC)   # bf16
            acc = acc + jnp.dot(patch, w_ref[dh],
                                preferred_element_type=jnp.float32)
        return acc                                                # (N*H, WC) f32

    def bn_train(y, g_ref, be_ref):
        # Training-mode BatchNorm2d: batch mean / biased variance, single pass.
        s1 = jnp.sum(y, axis=0, keepdims=True)          # (1, WC)
        s2 = jnp.sum(y * y, axis=0, keepdims=True)      # (1, WC)
        s1c = jnp.dot(s1, gsum_ref[...], preferred_element_type=jnp.float32)  # (1, C)
        s2c = jnp.dot(s2, gsum_ref[...], preferred_element_type=jnp.float32)  # (1, C)
        mean_c = s1c / cnt
        inv_c = lax.rsqrt(s2c / cnt - mean_c * mean_c + jnp.float32(EPS))
        mean = jnp.dot(mean_c, gbcast_ref[...], preferred_element_type=jnp.float32)
        inv = jnp.dot(inv_c, gbcast_ref[...], preferred_element_type=jnp.float32)
        return (y - mean) * (inv * g_ref[...]) + be_ref[...]

    x = x_ref[...]                                      # (N, H, WC) f32

    # Stage x into the H-padded bf16 scratch; only the 1-row borders need zeroing
    # (they stay zero for conv2 as well).
    pad_ref[:, 0:1, :] = jnp.zeros((N, 1, WC), pad_ref.dtype)
    pad_ref[:, H + 1:H + 2, :] = jnp.zeros((N, 1, WC), pad_ref.dtype)
    pad_ref[:, 1:H + 1, :] = x.astype(pad_ref.dtype)

    # conv1 -> bn1 -> relu   (conv biases dropped: they cancel under batch-stat BN)
    y1 = jnp.maximum(bn_train(conv(w1_ref), g1_ref, be1_ref), 0.0)   # (N*H, WC)

    # conv2 input: reuse the scratch interior (border rows already zero).
    pad_ref[:, 1:H + 1, :] = y1.astype(pad_ref.dtype).reshape(N, H, WC)

    # conv2 -> bn2 -> residual add -> relu  (lane-dense 128-wide store)
    y2 = bn_train(conv(w2_ref), g2_ref, be2_ref)                     # (N*H, WC)
    out_ref[...] = jnp.maximum(x + y2.reshape(N, H, WC), 0.0)


def _banded_weights(w_hwio, width):
    """Fold the 3 W-taps + zero W-padding of a 3x3 conv into banded matrices.

    Returns (3, W*Cin, W*Cout): y_row = patch_row @ out[dh], where patch_row packs
    width*Cin lanes of the (h + dh - 1)-shifted input row.
    """
    _, _, cin, cout = w_hwio.shape
    d = jnp.arange(width)[:, None] - jnp.arange(width)[None, :] + 1   # wi - wo + 1
    valid = ((d >= 0) & (d <= 2)).astype(w_hwio.dtype)
    taps = w_hwio[:, jnp.clip(d, 0, 2), :, :]                         # (3, W, W, Cin, Cout)
    taps = taps * valid[None, :, :, None, None]
    banded = jnp.transpose(taps, (0, 1, 3, 2, 4))                     # (3, W, Cin, W, Cout)
    return banded.reshape(3, width * cin, width * cout)


@jax.jit
def restnet_basic_block(x_nchw, params):
    """Forward pass of RestNetBasicBlock (stride=1, in_channels == out_channels)."""
    x = jnp.transpose(x_nchw, (0, 2, 3, 1)).astype(jnp.float32)       # NCHW -> NHWC
    N, H, W, C = x.shape
    WC = W * C
    x_slab = x.reshape(N, H, WC)

    # Banded conv weights, bf16 for the MXU. Conv biases b1/b2 are intentionally
    # not passed: training-mode BN subtracts the batch mean, so they cancel exactly.
    w1 = _banded_weights(params["w1"], W).astype(jnp.bfloat16)
    w2 = _banded_weights(params["w2"], W).astype(jnp.bfloat16)

    tile_lanes = lambda v: jnp.tile(v.astype(jnp.float32), W).reshape(1, WC)
    gsum = jnp.tile(jnp.eye(C, dtype=jnp.float32), (W, 1))            # (WC, C)
    gbcast = gsum.T                                                   # (C, WC)

    vmem = pl.BlockSpec(memory_space=pltpu.MemorySpace.VMEM)
    # TODO(synk): for real ResNet shapes, grid over batch/row tiles with a
    # two-phase (stats, then normalize) BN and v7x-sized (64 MiB VMEM) blocks +
    # 'parallel' dimension_semantics; the toy problem here fits a single
    # lane-dense VMEM-resident invocation (BN needs global batch statistics).
    out = pl.pallas_call(
        _resnet_block_kernel,
        out_shape=jax.ShapeDtypeStruct((N, H, WC), jnp.float32),
        in_specs=[vmem] * 9,
        out_specs=vmem,
        scratch_shapes=[pltpu.VMEM((N, H + 2, WC), jnp.bfloat16)],
    )(x_slab, w1, w2,
      tile_lanes(params["g1"]), tile_lanes(params["be1"]),
      tile_lanes(params["g2"]), tile_lanes(params["be2"]),
      gsum, gbcast)

    return jnp.transpose(out.reshape(N, H, W, C), (0, 3, 1, 2))       # NHWC -> NCHW


def _reference_block(x_nchw, params):
    """Pure-JAX (XLA) f32 reference matching the PyTorch forward."""
    dn = ("NCHW", "OIHW", "NCHW")

    def conv(x, w_hwio, b):
        w_oihw = jnp.transpose(w_hwio, (3, 2, 0, 1))
        y = lax.conv_general_dilated(x, w_oihw, (1, 1), "SAME",
                                     dimension_numbers=dn)
        return y + b.reshape(1, -1, 1, 1)

    def bn(y, g, be):
        mean = jnp.mean(y, axis=(0, 2, 3), keepdims=True)
        var = jnp.mean((y - mean) ** 2, axis=(0, 2, 3), keepdims=True)
        return (g.reshape(1, -1, 1, 1) * (y - mean) * lax.rsqrt(var + EPS)
                + be.reshape(1, -1, 1, 1))

    out = conv(x_nchw, params["w1"], params["b1"])
    out = jax.nn.relu(bn(out, params["g1"], params["be1"]))
    out = conv(out, params["w2"], params["b2"])
    out = bn(out, params["g2"], params["be2"])
    return jax.nn.relu(x_nchw + out)


def _init_params(key, channels):
    ks = jax.random.split(key, 8)
    f32 = jnp.float32
    return {
        "w1": (0.1 * jax.random.normal(ks[0], (3, 3, channels, channels))).astype(f32),
        "b1": (0.1 * jax.random.normal(ks[1], (channels,))).astype(f32),
        "g1": (1.0 + 0.1 * jax.random.normal(ks[2], (channels,))).astype(f32),
        "be1": (0.1 * jax.random.normal(ks[3], (channels,))).astype(f32),
        "w2": (0.1 * jax.random.normal(ks[4], (3, 3, channels, channels))).astype(f32),
        "b2": (0.1 * jax.random.normal(ks[5], (channels,))).astype(f32),
        "g2": (1.0 + 0.1 * jax.random.normal(ks[6], (channels,))).astype(f32),
        "be2": (0.1 * jax.random.normal(ks[7], (channels,))).astype(f32),
    }


if __name__ == "__main__":
    N, C, H, W = 2, 8, 16, 16  # stride=1, in_channels == out_channels; W*C = 128 lanes
    key = jax.random.PRNGKey(0)
    k_x, k_p = jax.random.split(key)
    x = jax.random.normal(k_x, (N, C, H, W), jnp.float32)
    params = _init_params(k_p, C)

    out = jax.block_until_ready(restnet_basic_block(x, params))
    ref = jax.block_until_ready(_reference_block(x, params))

    # Tolerance accounts for bf16 MXU operands in the Pallas path (reference is f32).
    np.testing.assert_allclose(np.asarray(out), np.asarray(ref), atol=5e-2, rtol=5e-2)
    assert out.shape == (N, C, H, W)
    print("KERNEL_OK")
</pallas_src>

<mosaic_0001>
module attributes {stable_mosaic.version = 11 : i64} {
  func.func @_resnet_block_kernel(%arg0: memref<2x16x128xf32, #tpu.memory_space<vmem>>, %arg1: memref<3x128x128xbf16, #tpu.memory_space<vmem>>, %arg2: memref<3x128x128xbf16, #tpu.memory_space<vmem>>, %arg3: memref<1x128xf32, #tpu.memory_space<vmem>>, %arg4: memref<1x128xf32, #tpu.memory_space<vmem>>, %arg5: memref<1x128xf32, #tpu.memory_space<vmem>>, %arg6: memref<1x128xf32, #tpu.memory_space<vmem>>, %arg7: memref<128x8xf32, #tpu.memory_space<vmem>>, %arg8: memref<8x128xf32, #tpu.memory_space<vmem>>, %arg9: memref<2x16x128xf32, #tpu.memory_space<vmem>>, %arg10: memref<2x18x128xbf16, #tpu.memory_space<vmem>>) attributes {dimension_semantics = [], scalar_prefetch = 0 : i64, scratch_operands = 1 : i64, tpu.core_type = #tpu.core_type<tc>} {
    %c0 = arith.constant 0 : index
    %c0_0 = arith.constant 0 : index
    %c0_1 = arith.constant 0 : index
    %0 = vector.load %arg0[%c0, %c0_0, %c0_1] : memref<2x16x128xf32, #tpu.memory_space<vmem>>, vector<2x16x128xf32>
    %cst = arith.constant 0.000000e+00 : bf16
    %1 = vector.broadcast %cst : bf16 to vector<2x1x128xbf16>
    %c0_2 = arith.constant 0 : index
    %c0_3 = arith.constant 0 : index
    %c0_4 = arith.constant 0 : index
    %2 = vector.load %arg10[%c0_2, %c0_3, %c0_4] : memref<2x18x128xbf16, #tpu.memory_space<vmem>>, vector<2x1x128xbf16>
    tpu.vector_store %arg10[%c0_2, %c0_3, %c0_4], %1 {strides = array<i32>} : memref<2x18x128xbf16, #tpu.memory_space<vmem>>, vector<2x1x128xbf16>,
    %cst_5 = arith.constant 0.000000e+00 : bf16
    %3 = vector.broadcast %cst_5 : bf16 to vector<2x1x128xbf16>
    %c0_6 = arith.constant 0 : index
    %c17 = arith.constant 17 : index
    %c0_7 = arith.constant 0 : index
    %4 = vector.load %arg10[%c0_6, %c17, %c0_7] : memref<2x18x128xbf16, #tpu.memory_space<vmem>>, vector<2x1x128xbf16>
    tpu.vector_store %arg10[%c0_6, %c17, %c0_7], %3 {strides = array<i32>} : memref<2x18x128xbf16, #tpu.memory_space<vmem>>, vector<2x1x128xbf16>,
    %5 = arith.truncf %0 : vector<2x16x128xf32> to vector<2x16x128xbf16>
    %c0_8 = arith.constant 0 : index
    %c1 = arith.constant 1 : index
    %c0_9 = arith.constant 0 : index
    %6 = vector.load %arg10[%c0_8, %c1, %c0_9] : memref<2x18x128xbf16, #tpu.memory_space<vmem>>, vector<2x16x128xbf16>
    tpu.vector_store %arg10[%c0_8, %c1, %c0_9], %5 {strides = array<i32>} : memref<2x18x128xbf16, #tpu.memory_space<vmem>>, vector<2x16x128xbf16>,
    %cst_10 = arith.constant 0.000000e+00 : f32
    %7 = vector.broadcast %cst_10 : f32 to vector<32x128xf32>
    %c0_11 = arith.constant 0 : index
    %c0_12 = arith.constant 0 : index
    %c0_13 = arith.constant 0 : index
    %8 = vector.load %arg10[%c0_11, %c0_12, %c0_13] : memref<2x18x128xbf16, #tpu.memory_space<vmem>>, vector<2x16x128xbf16>
    %9 = vector.shape_cast %8 : vector<2x16x128xbf16> to vector<32x128xbf16>
    %c0_14 = arith.constant 0 : index
    %c0_15 = arith.constant 0 : index
    %c0_16 = arith.constant 0 : index
    %10 = vector.load %arg1[%c0_14, %c0_15, %c0_16] : memref<3x128x128xbf16, #tpu.memory_space<vmem>>, vector<1x128x128xbf16>
    %11 = vector.shape_cast %10 : vector<1x128x128xbf16> to vector<128x128xbf16>
    %cst_17 = arith.constant dense<0.000000e+00> : vector<32x128xf32>
    %12 = tpu.matmul %9, %11, %cst_17 {dimension_numbers = #tpu.dot_dimension_numbers<[1], [0], [0], [1], [0, 0, 1, 1], [], []>} : vector<32x128xbf16>, vector<128x128xbf16>, vector<32x128xf32> -> vector<32x128xf32>
    %13 = arith.addf %7, %12 : vector<32x128xf32>
    %c0_18 = arith.constant 0 : index
    %c1_19 = arith.constant 1 : index
    %c0_20 = arith.constant 0 : index
    %14 = vector.load %arg10[%c0_18, %c1_19, %c0_20] : memref<2x18x128xbf16, #tpu.memory_space<vmem>>, vector<2x16x128xbf16>
    %15 = vector.shape_cast %14 : vector<2x16x128xbf16> to vector<32x128xbf16>
    %c1_21 = arith.constant 1 : index
    %c0_22 = arith.constant 0 : index
    %c0_23 = arith.constant 0 : index
    %16 = vector.load %arg1[%c1_21, %c0_22, %c0_23] : memref<3x128x128xbf16, #tpu.memory_space<vmem>>, vector<1x128x128xbf16>
    %17 = vector.shape_cast %16 : vector<1x128x128xbf16> to vector<128x128xbf16>
    %cst_24 = arith.constant dense<0.000000e+00> : vector<32x128xf32>
    %18 = tpu.matmul %15, %17, %cst_24 {dimension_numbers = #tpu.dot_dimension_numbers<[1], [0], [0], [1], [0, 0, 1, 1], [], []>} : vector<32x128xbf16>, vector<128x128xbf16>, vector<32x128xf32> -> vector<32x128xf32>
    %19 = arith.addf %13, %18 : vector<32x128xf32>
    %c0_25 = arith.constant 0 : index
    %c2 = arith.constant 2 : index
    %c0_26 = arith.constant 0 : index
    %20 = vector.load %arg10[%c0_25, %c2, %c0_26] : memref<2x18x128xbf16, #tpu.memory_space<vmem>>, vector<2x16x128xbf16>
    %21 = vector.shape_cast %20 : vector<2x16x128xbf16> to vector<32x128xbf16>
    %c2_27 = arith.constant 2 : index
    %c0_28 = arith.constant 0 : index
    %c0_29 = arith.constant 0 : index
    %22 = vector.load %arg1[%c2_27, %c0_28, %c0_29] : memref<3x128x128xbf16, #tpu.memory_space<vmem>>, vector<1x128x128xbf16>
    %23 = vector.shape_cast %22 : vector<1x128x128xbf16> to vector<128x128xbf16>
    %cst_30 = arith.constant dense<0.000000e+00> : vector<32x128xf32>
    %24 = tpu.matmul %21, %23, %cst_30 {dimension_numbers = #tpu.dot_dimension_numbers<[1], [0], [0], [1], [0, 0, 1, 1], [], []>} : vector<32x128xbf16>, vector<128x128xbf16>, vector<32x128xf32> -> vector<32x128xf32>
    %25 = arith.addf %19, %24 : vector<32x128xf32>
    %cst_31 = arith.constant dense<0.000000e+00> : vector<128xf32>
    %26 = vector.multi_reduction <add>, %25, %cst_31 [0] : vector<32x128xf32> to vector<128xf32>
    %27 = vector.shape_cast %26 : vector<128xf32> to vector<1x128xf32>
    %28 = arith.mulf %25, %25 : vector<32x128xf32>
    %cst_32 = arith.constant dense<0.000000e+00> : vector<128xf32>
    %29 = vector.multi_reduction <add>, %28, %cst_32 [0] : vector<32x128xf32> to vector<128xf32>
    %30 = vector.shape_cast %29 : vector<128xf32> to vector<1x128xf32>
    %c0_33 = arith.constant 0 : index
    %c0_34 = arith.constant 0 : index
    %31 = vector.load %arg7[%c0_33, %c0_34] : memref<128x8xf32, #tpu.memory_space<vmem>>, vector<128x8xf32>
    %cst_35 = arith.constant dense<0.000000e+00> : vector<1x8xf32>
    %32 = tpu.matmul %27, %31, %cst_35 {dimension_numbers = #tpu.dot_dimension_numbers<[1], [0], [0], [1], [0, 0, 1, 1], [], []>} : vector<1x128xf32>, vector<128x8xf32>, vector<1x8xf32> -> vector<1x8xf32>
    %c0_36 = arith.constant 0 : index
    %c0_37 = arith.constant 0 : index
    %33 = vector.load %arg7[%c0_36, %c0_37] : memref<128x8xf32, #tpu.memory_space<vmem>>, vector<128x8xf32>
    %cst_38 = arith.constant dense<0.000000e+00> : vector<1x8xf32>
    %34 = tpu.matmul %30, %33, %cst_38 {dimension_numbers = #tpu.dot_dimension_numbers<[1], [0], [0], [1], [0, 0, 1, 1], [], []>} : vector<1x128xf32>, vector<128x8xf32>, vector<1x8xf32> -> vector<1x8xf32>
    %cst_39 = arith.constant 5.120000e+02 : f32
    %35 = vector.broadcast %cst_39 : f32 to vector<1x8xf32>
    %36 = arith.divf %32, %35 : vector<1x8xf32>
    %cst_40 = arith.constant 5.120000e+02 : f32
    %37 = vector.broadcast %cst_40 : f32 to vector<1x8xf32>
    %38 = arith.divf %34, %37 : vector<1x8xf32>
    %39 = arith.mulf %36, %36 : vector<1x8xf32>
    %40 = arith.subf %38, %39 : vector<1x8xf32>
    %cst_41 = arith.constant 9.99999974E-6 : f32
    %41 = vector.broadcast %cst_41 : f32 to vector<1x8xf32>
    %42 = arith.addf %40, %41 : vector<1x8xf32>
    %43 = math.rsqrt %42 : vector<1x8xf32>
    %c0_42 = arith.constant 0 : index
    %c0_43 = arith.constant 0 : index
    %44 = vector.load %arg8[%c0_42, %c0_43] : memref<8x128xf32, #tpu.memory_space<vmem>>, vector<8x128xf32>
    %cst_44 = arith.constant dense<0.000000e+00> : vector<1x128xf32>
    %45 = tpu.matmul %36, %44, %cst_44 {dimension_numbers = #tpu.dot_dimension_numbers<[1], [0], [0], [1], [0, 0, 1, 1], [], []>} : vector<1x8xf32>, vector<8x128xf32>, vector<1x128xf32> -> vector<1x128xf32>
    %c0_45 = arith.constant 0 : index
    %c0_46 = arith.constant 0 : index
    %46 = vector.load %arg8[%c0_45, %c0_46] : memref<8x128xf32, #tpu.memory_space<vmem>>, vector<8x128xf32>
    %cst_47 = arith.constant dense<0.000000e+00> : vector<1x128xf32>
    %47 = tpu.matmul %43, %46, %cst_47 {dimension_numbers = #tpu.dot_dimension_numbers<[1], [0], [0], [1], [0, 0, 1, 1], [], []>} : vector<1x8xf32>, vector<8x128xf32>, vector<1x128xf32> -> vector<1x128xf32>
    %48 = vector.broadcast %45 : vector<1x128xf32> to vector<32x128xf32>
    %49 = arith.subf %25, %48 : vector<32x128xf32>
    %c0_48 = arith.constant 0 : index
    %c0_49 = arith.constant 0 : index
    %50 = vector.load %arg3[%c0_48, %c0_49] : memref<1x128xf32, #tpu.memory_space<vmem>>, vector<1x128xf32>
    %51 = arith.mulf %47, %50 : vector<1x128xf32>
    %52 = vector.broadcast %51 : vector<1x128xf32> to vector<32x128xf32>
    %53 = arith.mulf %49, %52 : vector<32x128xf32>
    %c0_50 = arith.constant 0 : index
    %c0_51 = arith.constant 0 : index
    %54 = vector.load %arg4[%c0_50, %c0_51] : memref<1x128xf32, #tpu.memory_space<vmem>>, vector<1x128xf32>
    %55 = vector.broadcast %54 : vector<1x128xf32> to vector<32x128xf32>
    %56 = arith.addf %53, %55 : vector<32x128xf32>
    %cst_52 = arith.constant 0.000000e+00 : f32
    %57 = vector.broadcast %cst_52 : f32 to vector<32x128xf32>
    %58 = arith.maximumf %56, %57 : vector<32x128xf32>
    %59 = arith.truncf %58 : vector<32x128xf32> to vector<32x128xbf16>
    %60 = vector.shape_cast %59 : vector<32x128xbf16> to vector<2x16x128xbf16>
    %c0_53 = arith.constant 0 : index
    %c1_54 = arith.constant 1 : index
    %c0_55 = arith.constant 0 : index
    %61 = vector.load %arg10[%c0_53, %c1_54, %c0_55] : memref<2x18x128xbf16, #tpu.memory_space<vmem>>, vector<2x16x128xbf16>
    tpu.vector_store %arg10[%c0_53, %c1_54, %c0_55], %60 {strides = array<i32>} : memref<2x18x128xbf16, #tpu.memory_space<vmem>>, vector<2x16x128xbf16>,
    %cst_56 = arith.constant 0.000000e+00 : f32
    %62 = vector.broadcast %cst_56 : f32 to vector<32x128xf32>
    %c0_57 = arith.constant 0 : index
    %c0_58 = arith.constant 0 : index
    %c0_59 = arith.constant 0 : index
    %63 = vector.load %arg10[%c0_57, %c0_58, %c0_59] : memref<2x18x128xbf16, #tpu.memory_space<vmem>>, vector<2x16x128xbf16>
    %64 = vector.shape_cast %63 : vector<2x16x128xbf16> to vector<32x128xbf16>
    %c0_60 = arith.constant 0 : index
    %c0_61 = arith.constant 0 : index
    %c0_62 = arith.constant 0 : index
    %65 = vector.load %arg2[%c0_60, %c0_61, %c0_62] : memref<3x128x128xbf16, #tpu.memory_space<vmem>>, vector<1x128x128xbf16>
    %66 = vector.shape_cast %65 : vector<1x128x128xbf16> to vector<128x128xbf16>
    %cst_63 = arith.constant dense<0.000000e+00> : vector<32x128xf32>
    %67 = tpu.matmul %64, %66, %cst_63 {dimension_numbers = #tpu.dot_dimension_numbers<[1], [0], [0], [1], [0, 0, 1, 1], [], []>} : vector<32x128xbf16>, vector<128x128xbf16>, vector<32x128xf32> -> vector<32x128xf32>
    %68 = arith.addf %62, %67 : vector<32x128xf32>
    %c0_64 = arith.constant 0 : index
    %c1_65 = arith.constant 1 : index
    %c0_66 = arith.constant 0 : index
    %69 = vector.load %arg10[%c0_64, %c1_65, %c0_66] : memref<2x18x128xbf16, #tpu.memory_space<vmem>>, vector<2x16x128xbf16>
    %70 = vector.shape_cast %69 : vector<2x16x128xbf16> to vector<32x128xbf16>
    %c1_67 = arith.constant 1 : index
    %c0_68 = arith.constant 0 : index
    %c0_69 = arith.constant 0 : index
    %71 = vector.load %arg2[%c1_67, %c0_68, %c0_69] : memref<3x128x128xbf16, #tpu.memory_space<vmem>>, vector<1x128x128xbf16>
    %72 = vector.shape_cast %71 : vector<1x128x128xbf16> to vector<128x128xbf16>
    %cst_70 = arith.constant dense<0.000000e+00> : vector<32x128xf32>
    %73 = tpu.matmul %70, %72, %cst_70 {dimension_numbers = #tpu.dot_dimension_numbers<[1], [0], [0], [1], [0, 0, 1, 1], [], []>} : vector<32x128xbf16>, vector<128x128xbf16>, vector<32x128xf32> -> vector<32x128xf32>
    %74 = arith.addf %68, %73 : vector<32x128xf32>
    %c0_71 = arith.constant 0 : index
    %c2_72 = arith.constant 2 : index
    %c0_73 = arith.constant 0 : index
    %75 = vector.load %arg10[%c0_71, %c2_72, %c0_73] : memref<2x18x128xbf16, #tpu.memory_space<vmem>>, vector<2x16x128xbf16>
    %76 = vector.shape_cast %75 : vector<2x16x128xbf16> to vector<32x128xbf16>
    %c2_74 = arith.constant 2 : index
    %c0_75 = arith.constant 0 : index
    %c0_76 = arith.constant 0 : index
    %77 = vector.load %arg2[%c2_74, %c0_75, %c0_76] : memref<3x128x128xbf16, #tpu.memory_space<vmem>>, vector<1x128x128xbf16>
    %78 = vector.shape_cast %77 : vector<1x128x128xbf16> to vector<128x128xbf16>
    %cst_77 = arith.constant dense<0.000000e+00> : vector<32x128xf32>
    %79 = tpu.matmul %76, %78, %cst_77 {dimension_numbers = #tpu.dot_dimension_numbers<[1], [0], [0], [1], [0, 0, 1, 1], [], []>} : vector<32x128xbf16>, vector<128x128xbf16>, vector<32x128xf32> -> vector<32x128xf32>
    %80 = arith.addf %74, %79 : vector<32x128xf32>
    %cst_78 = arith.constant dense<0.000000e+00> : vector<128xf32>
    %81 = vector.multi_reduction <add>, %80, %cst_78 [0] : vector<32x128xf32> to vector<128xf32>
    %82 = vector.shape_cast %81 : vector<128xf32> to vector<1x128xf32>
    %83 = arith.mulf %80, %80 : vector<32x128xf32>
    %cst_79 = arith.constant dense<0.000000e+00> : vector<128xf32>
    %84 = vector.multi_reduction <add>, %83, %cst_79 [0] : vector<32x128xf32> to vector<128xf32>
    %85 = vector.shape_cast %84 : vector<128xf32> to vector<1x128xf32>
    %c0_80 = arith.constant 0 : index
    %c0_81 = arith.constant 0 : index
    %86 = vector.load %arg7[%c0_80, %c0_81] : memref<128x8xf32, #tpu.memory_space<vmem>>, vector<128x8xf32>
    %cst_82 = arith.constant dense<0.000000e+00> : vector<1x8xf32>
    %87 = tpu.matmul %82, %86, %cst_82 {dimension_numbers = #tpu.dot_dimension_numbers<[1], [0], [0], [1], [0, 0, 1, 1], [], []>} : vector<1x128xf32>, vector<128x8xf32>, vector<1x8xf32> -> vector<1x8xf32>
    %c0_83 = arith.constant 0 : index
    %c0_84 = arith.constant 0 : index
    %88 = vector.load %arg7[%c0_83, %c0_84] : memref<128x8xf32, #tpu.memory_space<vmem>>, vector<128x8xf32>
    %cst_85 = arith.constant dense<0.000000e+00> : vector<1x8xf32>
    %89 = tpu.matmul %85, %88, %cst_85 {dimension_numbers = #tpu.dot_dimension_numbers<[1], [0], [0], [1], [0, 0, 1, 1], [], []>} : vector<1x128xf32>, vector<128x8xf32>, vector<1x8xf32> -> vector<1x8xf32>
    %cst_86 = arith.constant 5.120000e+02 : f32
    %90 = vector.broadcast %cst_86 : f32 to vector<1x8xf32>
    %91 = arith.divf %87, %90 : vector<1x8xf32>
    %cst_87 = arith.constant 5.120000e+02 : f32
    %92 = vector.broadcast %cst_87 : f32 to vector<1x8xf32>
    %93 = arith.divf %89, %92 : vector<1x8xf32>
    %94 = arith.mulf %91, %91 : vector<1x8xf32>
    %95 = arith.subf %93, %94 : vector<1x8xf32>
    %cst_88 = arith.constant 9.99999974E-6 : f32
    %96 = vector.broadcast %cst_88 : f32 to vector<1x8xf32>
    %97 = arith.addf %95, %96 : vector<1x8xf32>
    %98 = math.rsqrt %97 : vector<1x8xf32>
    %c0_89 = arith.constant 0 : index
    %c0_90 = arith.constant 0 : index
    %99 = vector.load %arg8[%c0_89, %c0_90] : memref<8x128xf32, #tpu.memory_space<vmem>>, vector<8x128xf32>
    %cst_91 = arith.constant dense<0.000000e+00> : vector<1x128xf32>
    %100 = tpu.matmul %91, %99, %cst_91 {dimension_numbers = #tpu.dot_dimension_numbers<[1], [0], [0], [1], [0, 0, 1, 1], [], []>} : vector<1x8xf32>, vector<8x128xf32>, vector<1x128xf32> -> vector<1x128xf32>
    %c0_92 = arith.constant 0 : index
    %c0_93 = arith.constant 0 : index
    %101 = vector.load %arg8[%c0_92, %c0_93] : memref<8x128xf32, #tpu.memory_space<vmem>>, vector<8x128xf32>
    %cst_94 = arith.constant dense<0.000000e+00> : vector<1x128xf32>
    %102 = tpu.matmul %98, %101, %cst_94 {dimension_numbers = #tpu.dot_dimension_numbers<[1], [0], [0], [1], [0, 0, 1, 1], [], []>} : vector<1x8xf32>, vector<8x128xf32>, vector<1x128xf32> -> vector<1x128xf32>
    %103 = vector.broadcast %100 : vector<1x128xf32> to vector<32x128xf32>
    %104 = arith.subf %80, %103 : vector<32x128xf32>
    %c0_95 = arith.constant 0 : index
    %c0_96 = arith.constant 0 : index
    %105 = vector.load %arg5[%c0_95, %c0_96] : memref<1x128xf32, #tpu.memory_space<vmem>>, vector<1x128xf32>
    %106 = arith.mulf %102, %105 : vector<1x128xf32>
    %107 = vector.broadcast %106 : vector<1x128xf32> to vector<32x128xf32>
    %108 = arith.mulf %104, %107 : vector<32x128xf32>
    %c0_97 = arith.constant 0 : index
    %c0_98 = arith.constant 0 : index
    %109 = vector.load %arg6[%c0_97, %c0_98] : memref<1x128xf32, #tpu.memory_space<vmem>>, vector<1x128xf32>
    %110 = vector.broadcast %109 : vector<1x128xf32> to vector<32x128xf32>
    %111 = arith.addf %108, %110 : vector<32x128xf32>
    %112 = vector.shape_cast %111 : vector<32x128xf32> to vector<2x16x128xf32>
    %113 = arith.addf %0, %112 : vector<2x16x128xf32>
    %cst_99 = arith.constant 0.000000e+00 : f32
    %114 = vector.broadcast %cst_99 : f32 to vector<2x16x128xf32>
    %115 = arith.maximumf %113, %114 : vector<2x16x128xf32>
    %c0_100 = arith.constant 0 : index
    %c0_101 = arith.constant 0 : index
    %c0_102 = arith.constant 0 : index
    %116 = vector.load %arg9[%c0_100, %c0_101, %c0_102] : memref<2x16x128xf32, #tpu.memory_space<vmem>>, vector<2x16x128xf32>
    tpu.vector_store %arg9[%c0_100, %c0_101, %c0_102], %115 {strides = array<i32>} : memref<2x16x128xf32, #tpu.memory_space<vmem>>, vector<2x16x128xf32>,
    return
  }
}

</mosaic_0001>

<bundles_post_ra>
// kernel: tile.29
= control target key start
LH: loop header
LB: loop body
LE: loop exit
PB: predicated region body
PF: predicated region fallthrough
CT: control target
= control target key end

     0   :  { %vm6_vm0 = vcmask 1043458   ;;  %vm10_vm1 = vcmask 1045508   ;;  %vm14_vm2 = vcmask 1047558   ;;  %s19_s6 = smov 3  ;;  %s22_s7 = smov 12  ;;  %vm16_vm3 = vcmask 64512   ;;  %s736_s0 = inlined_call_operand.vmem [shape: f32[16,8,8], index: 0, kind: input, shape index: {}]   ;;  %s737_s1 = inlined_call_operand.vmem [shape: f32[128,8], index: 1, kind: output, shape index: {}]  }
   0x1   :  { %v348_v0 = vld [vmem:[%s736_s0 + $0xf] ss:$16 sm:%s19_s6]   ;;  %s27_s12 = smov 48  ;;  %s32_s13 = smov 192  ;;  %vm38_vm4 = vcmask 1048512   ;;  %vm60_vm5 = vcmask 982912  }
   0x2   :  { %v349_v1 = vld [vmem:[%s736_s0 + $0xf] ss:$16 sm:%s22_s7]   ;;  %s63_s18 = smov 3  ;;  %s66_s21 = smov 12  ;;  %vm82_vm6 = vcmask 917312   ;;  %vm104_vm7 = vcmask 851712  }
   0x3   :  { %v25_v2 = vsel %vm6_vm0, %v349_v1, %v348_v0  ;;  %v350_v3 = vld [vmem:[%s736_s0 + $0xf] ss:$16 sm:%s27_s12]   ;;  %v356_v6 = vld [vmem:[%s736_s0 + $0xd] ss:$16 sm:%s63_s18]   ;;  %s71_s22 = smov 48  ;;  %s76_s27 = smov 192 }
   0x4   :  { %v351_v4 = vld [vmem:[%s736_s0 + $0xf] ss:$16 sm:%s32_s13]   ;;  %v30_v5 = vsel %vm10_vm1, %v350_v3, %v25_v2  ;;  %v357_v8 = vld [vmem:[%s736_s0 + $0xd] ss:$16 sm:%s66_s21]   ;;  %s423_s28 = smov 120   ;;  %s41_s2 = smov 3 }
   0x5   :  { %v35_v7 = vsel %vm14_vm2, %v351_v4, %v30_v5  ;;  %v358_v9 = vld [vmem:[%s736_s0 + $0xd] ss:$16 sm:%s71_s22]   ;;  %v69_v10 = vsel %vm6_vm0, %v357_v8, %v356_v6  ;;  %s44_s3 = smov 12  ;;  %v352_v13 = vld [vmem:[%s736_s0 + $0xe] ss:$16 sm:%s41_s2]   ;;  %s49_s8 = smov 48 }
   0x6   :  { %36 = vrot.lane.b32.xlu0 %v35_v7, %s423_s28  ;;  %v359_v11 = vld [vmem:[%s736_s0 + $0xd] ss:$16 sm:%s76_s27]   ;;  %v74_v12 = vsel %vm10_vm1, %v358_v9, %v69_v10  ;;  %s54_s9 = smov 192  ;;  %s85_s14 = smov 3  ;;  %vm126_vm8 = vcmask 786112   ;;  %vm148_vm9 = vcmask 720512  }
   0x7   :  { %v353_v14 = vld [vmem:[%s736_s0 + $0xe] ss:$16 sm:%s44_s3]   ;;  %v79_v15 = vsel %vm14_vm2, %v359_v11, %v74_v12  ;;  %s424_s15 = smov 104   ;;  %v360_v20 = vld [vmem:[%s736_s0 + $0xc] ss:$16 sm:%s85_s14]   ;;  %s88_s18 = smov 12 }
   0x8   :  { %v47_v16 = vsel %vm6_vm0, %v353_v14, %v352_v13  ;;  %v354_v17 = vld [vmem:[%s736_s0 + $0xe] ss:$16 sm:%s49_s8]   ;;  %80 = vrot.lane.b32.xlu1 %v79_v15, %s424_s15  ;;  %s93_s19 = smov 48  ;;  %s98_s24 = smov 192  ;;  %vm170_vm10 = vcmask 654912   ;;  %vm192_vm11 = vcmask 589312  }
   0x9   :  { %v355_v18 = vld [vmem:[%s736_s0 + $0xe] ss:$16 sm:%s54_s9]   ;;  %v52_v19 = vsel %vm10_vm1, %v354_v17, %v47_v16  ;;  %v361_v22 = vld [vmem:[%s736_s0 + $0xc] ss:$16 sm:%s88_s18]   ;;  %s425_s25 = smov 112   ;;  %s107_s28 = smov 3 }
   0xa   :  { %v57_v21 = vsel %vm14_vm2, %v355_v18, %v52_v19  ;;  %v362_v23 = vld [vmem:[%s736_s0 + $0xc] ss:$16 sm:%s93_s19]   ;;  %v91_v24 = vsel %vm6_vm0, %v361_v22, %v360_v20  ;;  %s110_s29 = smov 12  ;;  %v364_v27 = vld [vmem:[%s736_s0 + $0xb] ss:$16 sm:%s107_s28]   ;;  %s115_s5 = smov 48 }
   0xb   :  { %58 = vrot.lane.b32.xlu0 %v57_v21, %s425_s25  ;;  %v363_v25 = vld [vmem:[%s736_s0 + $0xc] ss:$16 sm:%s98_s24]   ;;  %v96_v26 = vsel %vm10_vm1, %v362_v23, %v91_v24  ;;  %s120_s6 = smov 192  ;;  %s129_s11 = smov 3  ;;  %vm214_vm12 = vcmask 523712   ;;  %vm236_vm13 = vcmask 458112  }
   0xc   :  { %v365_v28 = vld [vmem:[%s736_s0 + $0xb] ss:$16 sm:%s110_s29]   ;;  %v101_v29 = vsel %vm14_vm2, %v363_v25, %v96_v26  ;;  %s426_s12 = smov 96   ;;  %v368_v34 = vld [vmem:[%s736_s0 + $0xa] ss:$16 sm:%s129_s11]   ;;  %s132_s15 = smov 12 }
   0xd   :  { %v113_v30 = vsel %vm6_vm0, %v365_v28, %v364_v27  ;;  %v366_v31 = vld [vmem:[%s736_s0 + $0xb] ss:$16 sm:%s115_s5]   ;;  %102 = vrot.lane.b32.xlu1 %v101_v29, %s426_s12  ;;  %s137_s16 = smov 48  ;;  %s142_s21 = smov 192  ;;  %vm258_vm14 = vcmask 392512   ;;  %vm280_vm15 = vcmask 326912  }
   0xe   :  { %v367_v32 = vld [vmem:[%s736_s0 + $0xb] ss:$16 sm:%s120_s6]   ;;  %v118_v33 = vsel %vm10_vm1, %v366_v31, %v113_v30  ;;  %v369_v36 = vld [vmem:[%s736_s0 + $0xa] ss:$16 sm:%s132_s15]   ;;  %s427_s22 = smov 88   ;;  %s151_s25 = smov 3 }
   0xf   :  { %v123_v35 = vsel %vm14_vm2, %v367_v32, %v118_v33  ;;  %v370_v37 = vld [vmem:[%s736_s0 + $0xa] ss:$16 sm:%s137_s16]   ;;  %v135_v38 = vsel %vm6_vm0, %v369_v36, %v368_v34  ;;  %s154_s26 = smov 12  ;;  %v372_v41 = vld [vmem:[%s736_s0 + $0x9] ss:$16 sm:%s151_s25]   ;;  %s159_s2 = smov 48 }
  0x10   :  { %124 = vrot.lane.b32.xlu0 %v123_v35, %s427_s22  ;;  %v371_v39 = vld [vmem:[%s736_s0 + $0xa] ss:$16 sm:%s142_s21]   ;;  %v140_v40 = vsel %vm10_vm1, %v370_v37, %v135_v38  ;;  %s164_s3 = smov 192  ;;  %s173_s8 = smov 3 }
  0x11   :  { %v373_v42 = vld [vmem:[%s736_s0 + $0x9] ss:$16 sm:%s154_s26]   ;;  %v145_v43 = vsel %vm14_vm2, %v371_v39, %v140_v40  ;;  %s428_s9 = smov 80   ;;  %v376_v48 = vld [vmem:[%s736_s0 + $0x8] ss:$16 sm:%s173_s8]   ;;  %s176_s12 = smov 12 }
  0x12   :  { %v157_v44 = vsel %vm6_vm0, %v373_v42, %v372_v41  ;;  %v374_v45 = vld [vmem:[%s736_s0 + $0x9] ss:$16 sm:%s159_s2]   ;;  %146 = vrot.lane.b32.xlu1 %v145_v43, %s428_s9  ;;  %s181_s13 = smov 48  ;;  %s186_s18 = smov 192 }
  0x13   :  { %v375_v46 = vld [vmem:[%s736_s0 + $0x9] ss:$16 sm:%s164_s3]   ;;  %v162_v47 = vsel %vm10_vm1, %v374_v45, %v157_v44  ;;  %v377_v50 = vld [vmem:[%s736_s0 + $0x8] ss:$16 sm:%s176_s12]   ;;  %s429_s19 = smov 72   ;;  %s195_s22 = smov 3 }
  0x14   :  { %v167_v49 = vsel %vm14_vm2, %v375_v46, %v162_v47  ;;  %v378_v51 = vld [vmem:[%s736_s0 + $0x8] ss:$16 sm:%s181_s13]   ;;  %v179_v52 = vsel %vm6_vm0, %v377_v50, %v376_v48  ;;  %s198_s23 = smov 12  ;;  %v380_v55 = vld [vmem:[%s736_s0 + $0x7] ss:$16 sm:%s195_s22]   ;;  %s203_s28 = smov 48 }
  0x15   :  { %168 = vrot.lane.b32.xlu0 %v167_v49, %s429_s19  ;;  %v379_v53 = vld [vmem:[%s736_s0 + $0x8] ss:$16 sm:%s186_s18]   ;;  %v184_v54 = vsel %vm10_vm1, %v378_v51, %v179_v52  ;;  %s208_s29 = smov 192  ;;  %s217_s5 = smov 3 }
  0x16   :  { %v381_v56 = vld [vmem:[%s736_s0 + $0x7] ss:$16 sm:%s198_s23]   ;;  %v189_v57 = vsel %vm14_vm2, %v379_v53, %v184_v54  ;;  %s430_s6 = smov 64   ;;  %v384_v62 = vld [vmem:[%s736_s0 + $0x6] ss:$16 sm:%s217_s5]   ;;  %s220_s9 = smov 12 }
  0x17   :  { %v201_v58 = vsel %vm6_vm0, %v381_v56, %v380_v55  ;;  %v382_v59 = vld [vmem:[%s736_s0 + $0x7] ss:$16 sm:%s203_s28]   ;;  %190 = vrot.lane.b32.xlu1 %v189_v57, %s430_s6  ;;  %s225_s10 = smov 48  ;;  %s230_s15 = smov 192 }
  0x18   :  { %v383_v60 = vld [vmem:[%s736_s0 + $0x7] ss:$16 sm:%s208_s29]   ;;  %v206_v61 = vsel %vm10_vm1, %v382_v59, %v201_v58  ;;  %v385_v0 = vld [vmem:[%s736_s0 + $0x6] ss:$16 sm:%s220_s9]   ;;  %s431_s16 = smov 56   ;;  %s239_s19 = smov 3 }
  0x19   :  { %v211_v63 = vsel %vm14_vm2, %v383_v60, %v206_v61  ;;  %v386_v1 = vld [vmem:[%s736_s0 + $0x6] ss:$16 sm:%s225_s10]   ;;  %v223_v2 = vsel %vm6_vm0, %v385_v0, %v384_v62  ;;  %s242_s20 = smov 12  ;;  %v388_v5 = vld [vmem:[%s736_s0 + $0x5] ss:$16 sm:%s239_s19]   ;;  %s247_s25 = smov 48 }
  0x1a   :  { %212 = vrot.lane.b32.xlu0 %v211_v63, %s431_s16  ;;  %v387_v3 = vld [vmem:[%s736_s0 + $0x6] ss:$16 sm:%s230_s15]   ;;  %v228_v4 = vsel %vm10_vm1, %v386_v1, %v223_v2  ;;  %s252_s26 = smov 192  ;;  %s261_s2 = smov 3 }
  0x1b   :  { %v389_v6 = vld [vmem:[%s736_s0 + $0x5] ss:$16 sm:%s242_s20]   ;;  %v233_v7 = vsel %vm14_vm2, %v387_v3, %v228_v4  ;;  %s432_s3 = smov 48   ;;  %v392_v12 = vld [vmem:[%s736_s0 + $0x4] ss:$16 sm:%s261_s2]   ;;  %s264_s6 = smov 12 }
  0x1c   :  { %v245_v8 = vsel %vm6_vm0, %v389_v6, %v388_v5  ;;  %v390_v9 = vld [vmem:[%s736_s0 + $0x5] ss:$16 sm:%s247_s25]   ;;  %234 = vrot.lane.b32.xlu1 %v233_v7, %s432_s3  ;;  %s269_s7 = smov 48  ;;  %s274_s12 = smov 192 }
  0x1d   :  { %v391_v10 = vld [vmem:[%s736_s0 + $0x5] ss:$16 sm:%s252_s26]   ;;  %v250_v11 = vsel %vm10_vm1, %v390_v9, %v245_v8  ;;  %v393_v14 = vld [vmem:[%s736_s0 + $0x4] ss:$16 sm:%s264_s6]   ;;  %s433_s13 = smov 40   ;;  %s283_s16 = smov 3 }
  0x1e   :  { %v255_v13 = vsel %vm14_vm2, %v391_v10, %v250_v11  ;;  %v394_v15 = vld [vmem:[%s736_s0 + $0x4] ss:$16 sm:%s269_s7]   ;;  %v267_v16 = vsel %vm6_vm0, %v393_v14, %v392_v12  ;;  %s286_s17 = smov 12  ;;  %v396_v19 = vld [vmem:[%s736_s0 + $0x3] ss:$16 sm:%s283_s16]   ;;  %s291_s22 = smov 48 }
  0x1f   :  { %256 = vrot.lane.b32.xlu0 %v255_v13, %s433_s13  ;;  %v395_v17 = vld [vmem:[%s736_s0 + $0x4] ss:$16 sm:%s274_s12]   ;;  %v272_v18 = vsel %vm10_vm1, %v394_v15, %v267_v16  ;;  %s296_s23 = smov 192  ;;  %s305_s28 = smov 3 }
  0x20   :  { %v397_v20 = vld [vmem:[%s736_s0 + $0x3] ss:$16 sm:%s286_s17]   ;;  %v277_v21 = vsel %vm14_vm2, %v395_v17, %v272_v18  ;;  %s434_s29 = smov 32   ;;  %v400_v26 = vld [vmem:[%s736_s0 + $0x2] ss:$16 sm:%s305_s28]   ;;  %s308_s3 = smov 12 }
  0x21   :  { %v289_v22 = vsel %vm6_vm0, %v397_v20, %v396_v19  ;;  %v398_v23 = vld [vmem:[%s736_s0 + $0x3] ss:$16 sm:%s291_s22]   ;;  %278 = vrot.lane.b32.xlu1 %v277_v21, %s434_s29  ;;  %s313_s4 = smov 48  ;;  %s318_s9 = smov 192 }
  0x22   :  { %v399_v24 = vld [vmem:[%s736_s0 + $0x3] ss:$16 sm:%s296_s23]   ;;  %v294_v25 = vsel %vm10_vm1, %v398_v23, %v289_v22  ;;  %v401_v28 = vld [vmem:[%s736_s0 + $0x2] ss:$16 sm:%s308_s3]   ;;  %s435_s10 = smov 24   ;;  %s327_s13 = smov 3 }
  0x23   :  { %v299_v27 = vsel %vm14_vm2, %v399_v24, %v294_v25  ;;  %v402_v29 = vld [vmem:[%s736_s0 + $0x2] ss:$16 sm:%s313_s4]   ;;  %v311_v30 = vsel %vm6_vm0, %v401_v28, %v400_v26  ;;  %s330_s14 = smov 12  ;;  %v404_v33 = vld [vmem:[%s736_s0 + $0x1] ss:$16 sm:%s327_s13]   ;;  %s335_s19 = smov 48 }
  0x24   :  { %300 = vrot.lane.b32.xlu0 %v299_v27, %s435_s10  ;;  %v403_v31 = vld [vmem:[%s736_s0 + $0x2] ss:$16 sm:%s318_s9]   ;;  %v316_v32 = vsel %vm10_vm1, %v402_v29, %v311_v30  ;;  %s340_s20 = smov 192  ;;  %s2_s25 = smov 3 }
  0x25   :  { %v405_v34 = vld [vmem:[%s736_s0 + $0x1] ss:$16 sm:%s330_s14]   ;;  %v321_v35 = vsel %vm14_vm2, %v403_v31, %v316_v32  ;;  %s436_s26 = smov 16   ;;  %s4_s27 = smov 12  ;;  %v3_v40 = vld [vmem:[%s736_s0] ss:$16 sm:%s2_s25]  }
  0x26   :  { %v333_v36 = vsel %vm6_vm0, %v405_v34, %v404_v33  ;;  %v406_v37 = vld [vmem:[%s736_s0 + $0x1] ss:$16 sm:%s335_s19]   ;;  %322 = vrot.lane.b32.xlu1 %v321_v35, %s436_s26  ;;  %s8_s28 = smov 48  ;;  %s12_s2 = smov 192 }
  0x27   :  { %v407_v38 = vld [vmem:[%s736_s0 + $0x1] ss:$16 sm:%s340_s20]   ;;  %v338_v39 = vsel %vm10_vm1, %v406_v37, %v333_v36  ;;  %v5_v42 = vld [vmem:[%s736_s0] ss:$16 sm:%s4_s27]   ;;  %s437_s7 = smov 8  }
  0x28   :  { %v343_v41 = vsel %vm14_vm2, %v407_v38, %v338_v39  ;;  %v9_v43 = vld [vmem:[%s736_s0] ss:$16 sm:%s8_s28]   ;;  %v7_v44 = vsel %vm6_vm0, %v5_v42, %v3_v40  ;;  %vm302_vm0 = vcmask 261312  }
  0x29   :  { %344 = vrot.lane.b32.xlu0 %v343_v41, %s437_s7  ;;  %v13_v45 = vld [vmem:[%s736_s0] ss:$16 sm:%s12_s2]   ;;  %v11_v46 = vsel %vm10_vm1, %v9_v43, %v7_v44  ;;  %vm324_vm1 = vcmask 195712  }
  0x2a   :  { %v15_v47 = vsel %vm14_vm2, %v13_v45, %v11_v46  ;;  %vm346_vm2 = vcmask 130112  }
  0x2b   :  { %17 = vst.msk [vmem:[%s737_s1] sm:$0xff] %vm16_vm3, %v15_v47  }
  0x78   :  { %v37_v48 = vpop.permute.xlu0 %36  }
  0x79   :  { %39 = vst.msk [vmem:[%s737_s1] sm:$0xff] %vm38_vm4, %v37_v48  }
  0x7a   :  { %v81_v49 = vpop.permute.xlu1 %80  }
  0x7d   :  { %v59_v50 = vpop.permute.xlu0 %58  }
  0x7e   :  { %61 = vst.msk [vmem:[%s737_s1] sm:$0xff] %vm60_vm5, %v59_v50  }
  0x7f   :  { %83 = vst.msk [vmem:[%s737_s1] sm:$0xff] %vm82_vm6, %v81_v49   ;;  %v103_v51 = vpop.permute.xlu1 %102  }
  0x80   :  { %105 = vst.msk [vmem:[%s737_s1] sm:$0xff] %vm104_vm7, %v103_v51  }
  0x82   :  { %v125_v52 = vpop.permute.xlu0 %124  }
  0x83   :  { %127 = vst.msk [vmem:[%s737_s1] sm:$0xff] %vm126_vm8, %v125_v52  }
  0x84   :  { %v147_v53 = vpop.permute.xlu1 %146  }
  0x85   :  { %149 = vst.msk [vmem:[%s737_s1] sm:$0xff] %vm148_vm9, %v147_v53  }
  0x87   :  { %v169_v54 = vpop.permute.xlu0 %168  }
  0x88   :  { %171 = vst.msk [vmem:[%s737_s1] sm:$0xff] %vm170_vm10, %v169_v54  }
  0x89   :  { %v191_v55 = vpop.permute.xlu1 %190  }
  0x8a   :  { %193 = vst.msk [vmem:[%s737_s1] sm:$0xff] %vm192_vm11, %v191_v55  }
  0x8c   :  { %v213_v56 = vpop.permute.xlu0 %212  }
  0x8d   :  { %215 = vst.msk [vmem:[%s737_s1] sm:$0xff] %vm214_vm12, %v213_v56  }
  0x8e   :  { %v235_v57 = vpop.permute.xlu1 %234  }
  0x8f   :  { %237 = vst.msk [vmem:[%s737_s1] sm:$0xff] %vm236_vm13, %v235_v57  }
  0x91   :  { %v257_v58 = vpop.permute.xlu0 %256  }
  0x92   :  { %259 = vst.msk [vmem:[%s737_s1] sm:$0xff] %vm258_vm14, %v257_v58  }
  0x93   :  { %v279_v59 = vpop.permute.xlu1 %278  }
  0x94   :  { %281 = vst.msk [vmem:[%s737_s1] sm:$0xff] %vm280_vm15, %v279_v59  }
  0x96   :  { %v301_v60 = vpop.permute.xlu0 %300  }
  0x97   :  { %303 = vst.msk [vmem:[%s737_s1] sm:$0xff] %vm302_vm0, %v301_v60  }
  0x98   :  { %v323_v61 = vpop.permute.xlu1 %322  }
  0x99   :  { %325 = vst.msk [vmem:[%s737_s1] sm:$0xff] %vm324_vm1, %v323_v61  }
  0x9b   :  { %v345_v62 = vpop.permute.xlu0 %344  }
  0x9c   :  { %347 = vst.msk [vmem:[%s737_s1] sm:$0xff] %vm346_vm2, %v345_v62  }

// kernel: tile.33
= control target key start
LH: loop header
LB: loop body
LE: loop exit
PB: predicated region body
PF: predicated region fallthrough
CT: control target
= control target key end

     0   :  { %s28_s0 = inlined_call_operand.vmem [shape: f32[8], index: 0, kind: input, shape index: {}]   ;;  %s29_s1 = inlined_call_operand.vmem [shape: f32[16,8], index: 1, kind: output, shape index: {}]  }
   0x1   :  { %v4_v0 = vld [vmem:[%s28_s0] ss:$0 sm:$0xff] }
   0x2   :  { %5 = vst [vmem:[%s29_s1] sm:$0xff] %v4_v0  ;;  %8 = vst [vmem:[%s29_s1 + $0x8] sm:$0xff] %v4_v0 }

// kernel: tile.34
= control target key start
LH: loop header
LB: loop body
LE: loop exit
PB: predicated region body
PF: predicated region fallthrough
CT: control target
= control target key end

     0   :  { %s131_s10 = smov 120   ;;  %s132_s11 = smov 104   ;;  %vm3_vm0 = vcmask 64512   ;;  %vm9_vm1 = vcmask 1048512   ;;  %vm15_vm2 = vcmask 982912   ;;  %vm21_vm3 = vcmask 917312   ;;  %s207_s0 = inlined_call_operand.vmem [shape: f32[16,8], index: 0, kind: input, shape index: {}]   ;;  %s208_s1 = inlined_call_operand.vmem [shape: f32[1,128], index: 1, kind: output, shape index: {}]  }
   0x1   :  { %v101_v0 = vld [vmem:[%s207_s0 + $0xf] sm:$0x1]   ;;  %v103_v1 = vld [vmem:[%s207_s0 + $0xd] sm:$0x1]   ;;  %v102_v2 = vld [vmem:[%s207_s0 + $0xe] sm:$0x1]  }
   0x2   :  { %7 = vrot.lane.b32.xlu0 %v101_v0, %s131_s10  ;;  %19 = vrot.lane.b32.xlu1 %v103_v1, %s132_s11  ;;  %v104_v3 = vld [vmem:[%s207_s0 + $0xc] sm:$0x1]   ;;  %s133_s16 = smov 112   ;;  %s134_s17 = smov 96   ;;  %v105_v4 = vld [vmem:[%s207_s0 + $0xb] sm:$0x1]  }
   0x3   :  { %v106_v5 = vld [vmem:[%s207_s0 + $0xa] sm:$0x1]   ;;  %v2_v6 = vld [vmem:[%s207_s0] sm:$0x1]   ;;  %s135_s24 = smov 88   ;;  %s136_s25 = smov 80  }
   0x4   :  { %4 = vst.msk [vmem:[#allocation0] sm:$0x1] %vm3_vm0, %v2_v6   ;;  %v107_v7 = vld [vmem:[%s207_s0 + $0x9] sm:$0x1]   ;;  %v108_v8 = vld [vmem:[%s207_s0 + $0x8] sm:$0x1]  }
   0x5   :  { %s137_s30 = smov 72   ;;  %s138_s2 = smov 64   ;;  %v109_v9 = vld [vmem:[%s207_s0 + $0x7] sm:$0x1]   ;;  %v110_v10 = vld [vmem:[%s207_s0 + $0x6] sm:$0x1]  }
   0x6   :  { %13 = vrot.lane.b32.xlu0 %v102_v2, %s133_s16  ;;  %25 = vrot.lane.b32.xlu1 %v104_v3, %s134_s17  ;;  %s139_s7 = smov 56   ;;  %s140_s8 = smov 48   ;;  %v111_v11 = vld [vmem:[%s207_s0 + $0x5] sm:$0x1]   ;;  %v112_v12 = vld [vmem:[%s207_s0 + $0x4] sm:$0x1]  }
   0x7   :  { %s141_s13 = smov 40   ;;  %s142_s14 = smov 32   ;;  %v113_v13 = vld [vmem:[%s207_s0 + $0x3] sm:$0x1]   ;;  %v114_v14 = vld [vmem:[%s207_s0 + $0x2] sm:$0x1]  }
   0x8   :  { %s143_s19 = smov 24   ;;  %s144_s20 = smov 16   ;;  %v115_v15 = vld [vmem:[%s207_s0 + $0x1] sm:$0x1]   ;;  %vm27_vm4 = vcmask 851712   ;;  %vm33_vm5 = vcmask 786112  }
   0x9   :  { %s145_s0 = smov 8   ;;  %vm39_vm6 = vcmask 720512   ;;  %vm45_vm7 = vcmask 654912   ;;  %vm51_vm8 = vcmask 589312   ;;  %vm57_vm9 = vcmask 523712  }
   0xa   :  { %31 = vrot.lane.b32.xlu0 %v105_v4, %s135_s24  ;;  %37 = vrot.lane.b32.xlu1 %v106_v5, %s136_s25  ;;  %vm63_vm10 = vcmask 458112   ;;  %vm69_vm11 = vcmask 392512   ;;  %vm75_vm12 = vcmask 326912   ;;  %vm81_vm13 = vcmask 261312  }
   0xb   :  { %vm87_vm14 = vcmask 195712   ;;  %vm93_vm15 = vcmask 130112  }
   0xe   :  { %43 = vrot.lane.b32.xlu0 %v107_v7, %s137_s30  ;;  %49 = vrot.lane.b32.xlu1 %v108_v8, %s138_s2 }
  0x12   :  { %55 = vrot.lane.b32.xlu0 %v109_v9, %s139_s7  ;;  %61 = vrot.lane.b32.xlu1 %v110_v10, %s140_s8 }
  0x16   :  { %67 = vrot.lane.b32.xlu0 %v111_v11, %s141_s13  ;;  %73 = vrot.lane.b32.xlu1 %v112_v12, %s142_s14 }
  0x1a   :  { %79 = vrot.lane.b32.xlu0 %v113_v13, %s143_s19  ;;  %85 = vrot.lane.b32.xlu1 %v114_v14, %s144_s20 }
  0x1e   :  { %91 = vrot.lane.b32.xlu0 %v115_v15, %s145_s0 }
  0x74   :  { %v8_v16 = vpop.permute.xlu0 %7   ;;  %v20_v17 = vpop.permute.xlu1 %19  }
  0x75   :  { %10 = vst.msk [vmem:[#allocation0] sm:$0x1] %vm9_vm1, %v8_v16  }
  0x78   :  { %v14_v18 = vpop.permute.xlu0 %13   ;;  %v26_v19 = vpop.permute.xlu1 %25  }
  0x79   :  { %16 = vst.msk [vmem:[#allocation0] sm:$0x1] %vm15_vm2, %v14_v18  }
  0x7a   :  { %22 = vst.msk [vmem:[#allocation0] sm:$0x1] %vm21_vm3, %v20_v17  }
  0x7b   :  { %28 = vst.msk [vmem:[#allocation0] sm:$0x1] %vm27_vm4, %v26_v19  }
  0x7c   :  { %v32_v20 = vpop.permute.xlu0 %31   ;;  %v38_v21 = vpop.permute.xlu1 %37  }
  0x7d   :  { %34 = vst.msk [vmem:[#allocation0] sm:$0x1] %vm33_vm5, %v32_v20  }
  0x7e   :  { %40 = vst.msk [vmem:[#allocation0] sm:$0x1] %vm39_vm6, %v38_v21  }
  0x80   :  { %v44_v22 = vpop.permute.xlu0 %43   ;;  %v50_v23 = vpop.permute.xlu1 %49  }
  0x81   :  { %46 = vst.msk [vmem:[#allocation0] sm:$0x1] %vm45_vm7, %v44_v22  }
  0x82   :  { %52 = vst.msk [vmem:[#allocation0] sm:$0x1] %vm51_vm8, %v50_v23  }
  0x84   :  { %v56_v24 = vpop.permute.xlu0 %55   ;;  %v62_v25 = vpop.permute.xlu1 %61  }
  0x85   :  { %58 = vst.msk [vmem:[#allocation0] sm:$0x1] %vm57_vm9, %v56_v24  }
  0x86   :  { %64 = vst.msk [vmem:[#allocation0] sm:$0x1] %vm63_vm10, %v62_v25  }
  0x88   :  { %v68_v26 = vpop.permute.xlu0 %67   ;;  %v74_v27 = vpop.permute.xlu1 %73  }
  0x89   :  { %70 = vst.msk [vmem:[#allocation0] sm:$0x1] %vm69_vm11, %v68_v26  }
  0x8a   :  { %76 = vst.msk [vmem:[#allocation0] sm:$0x1] %vm75_vm12, %v74_v27  }
  0x8c   :  { %v80_v28 = vpop.permute.xlu0 %79   ;;  %v86_v29 = vpop.permute.xlu1 %85  }
  0x8d   :  { %82 = vst.msk [vmem:[#allocation0] sm:$0x1] %vm81_vm13, %v80_v28  }
  0x8e   :  { %88 = vst.msk [vmem:[#allocation0] sm:$0x1] %vm87_vm14, %v86_v29  }
  0x90   :  { %v92_v30 = vpop.permute.xlu0 %91  }
  0x91   :  { %94 = vst.msk [vmem:[#allocation0] sm:$0x1] %vm93_vm15, %v92_v30  }
  0x98   :  { %v98_v31 = vld [vmem:[#allocation0] sm:$0x1] }
  0x99   :  { %100 = vst [vmem:[%s208_s1] sm:$0x1] %v98_v31 }

// kernel: restnet_basic_block.1
= control target key start
LH: loop header
LB: loop body
LE: loop exit
PB: predicated region body
PF: predicated region fallthrough
CT: control target
= control target key end

     0   :  { %v2572_v2 = vmov 0.0|0.0   ;;  %vm37_vm0 = vcmask 1040384   ;;  %vm38_vm1 = vsmask.f32 256  ;;  %v40_v4 = vld [vmem:[#allocation2] sm:$0x1]  ;;  %s3191_s1 = inlined_call_operand.vmem [shape: bf16[3,128,128], index: 1, kind: input, shape index: {}]   ;;  %s3192_s0 = inlined_call_operand.vmem [shape: f32[2,16,128], index: 0, kind: input, shape index: {}]   ;;  %s3193_s7 = inlined_call_operand.vmem [shape: f32[128,8], index: 7, kind: input, shape index: {}]   ;;  %s3194_s8 = inlined_call_operand.vmem [shape: f32[8,128], index: 8, kind: input, shape index: {}]   ;;  %s3195_s2 = inlined_call_operand.vmem [shape: bf16[3,128,128], index: 2, kind: input, shape index: {}]   ;;  %s3196_s3 = inlined_call_operand.vmem [shape: f32[1,128], index: 3, kind: input, shape index: {}]   ;;  %s3197_s4 = inlined_call_operand.vmem [shape: f32[1,128], index: 4, kind: input, shape index: {}]   ;;  %s3198_s5 = inlined_call_operand.vmem [shape: f32[1,128], index: 5, kind: input, shape index: {}]   ;;  %s3199_s6 = inlined_call_operand.vmem [shape: f32[1,128], index: 6, kind: input, shape index: {}]   ;;  %s3200_s9 = inlined_call_operand.vmem [shape: f32[2,16,128], index: 9, kind: output, shape index: {}]  }
   0x1   :  { %v2512_v0 = vld [vmem:[%s3191_s1 + $0x40] sm:$0xff]   ;;  %v2513_v1 = vld [vmem:[%s3191_s1 + $0x48] sm:$0xff]   ;;  %2397 = vmatprep.subr.bf16.mxu1 %v2572_v2  ;;  %v2514_v3 = vld [vmem:[%s3191_s1 + $0x50] sm:$0xff]   ;;  %vm46_vm2 = vsmask.f32 7938  ;;  %vm108_vm6 = vcmask 1043456  }
   0x2   :  { %2117 = vmatprep.subr.bf16.mxu0 %v2512_v0  ;;  %v2515_v5 = vld [vmem:[%s3191_s1 + $0x58] sm:$0xff]   ;;  %v33_v6 = vld [vmem:[%s3192_s0] sm:$0xff]  ;;  %v34_v7 = vld [vmem:[%s3192_s0 + $0x8] sm:$0xff]  ;;  %vm66_vm5 = vsmask.f32 4368  ;;  %vm434_vm12 = vcmask 1042432  }
   0x3   :  { %2118 = vmatpush3.bf16.msra.mxu0 %v2512_v0  ;;  %v35_v8 = vld [vmem:[%s3192_s0 + $0x10] sm:$0xff]  ;;  %vm2649_vm3 = vmand %vm37_vm0, %vm38_vm1  ;;  %v43_v10 = vld [vmem:[#allocation2 + $0xc] sm:$0x1]  ;;  %v1973_v12 = vpack.c.bf16 %v33_v6, %v33_v6  ;;  %v1974_v13 = vpack.c.bf16 %v34_v7, %v34_v7  ;;  %vm146_vm9 = vsmask.f32 3328  ;;  %vm435_vm13 = vcmask 1046532  }
   0x4   :  { %2119 = vmatprep.subr.bf16.mxu0 %v2513_v1  ;;  %v48_v11 = vld [vmem:[#allocation2 + $0x8] sm:$0x1]  ;;  %v1975_v14 = vpack.c.bf16 %v35_v8, %v35_v8  ;;  %v2516_v15 = vld [vmem:[%s3191_s1 + $0x60] sm:$0xff]   ;;  %v41_v16 = vsel %vm2649_vm3, 0, %v40_v4  ;;  %v44_v17 = vsel %vm2649_vm3, 0, %v43_v10  ;;  %vm2662_vm4 = vmand %vm37_vm0, %vm46_vm2  ;;  %vm2573_vm15 = vmmov 0  }
   0x5   :  { %v51_v19 = vld [vmem:[#allocation2 + $0x14] sm:$0x1]  ;;  %42 = vst [vmem:[#allocation2] sm:$0x1] %v41_v16  ;;  %45 = vst [vmem:[#allocation2 + $0xc] sm:$0x1] %v44_v17 }
   0x6   :  { %v49_v20 = vsel %vm2662_vm4, 0, %v48_v11  ;;  %v52_v21 = vsel %vm2662_vm4, 0, %v51_v19  ;;  %v69_v22 = vshrl.u32 %v1973_v12, 16  ;;  %v72_v23 = vshll.u32 %v1973_v12, 16  ;;  %v36_v29 = vld [vmem:[%s3192_s0 + $0x18] sm:$0xff]  ;;  %v2517_v30 = vld [vmem:[%s3191_s1 + $0x68] sm:$0xff]   ;;  %vm2678_vm7 = vmor %vm38_vm1, %vm66_vm5 }
   0x7   :  { %2120 = vmatpush3.bf16.msra.mxu0 %v2513_v1  ;;  %50 = vst [vmem:[#allocation2 + $0x8] sm:$0x1] %v49_v20  ;;  %v77_v24 = vshrl.u32 %v1974_v13, 16  ;;  %v80_v25 = vshll.u32 %v1974_v13, 16  ;;  %v86_v26 = vshrl.u32 %v1975_v14, 16  ;;  %v89_v27 = vshll.u32 %v1975_v14, 16  ;;  %vm2683_vm8 = vmand %vm108_vm6, %vm46_vm2 }
   0x8   :  { %2121 = vmatprep.subr.bf16.mxu0 %v2514_v3  ;;  %53 = vst [vmem:[#allocation2 + $0x14] sm:$0x1] %v52_v21  ;;  %v71_v28 = vrot.slane %v69_v22, 7  ;;  %v1976_v33 = vpack.c.bf16 %v36_v29, %v36_v29  ;;  %v2518_v43 = vld [vmem:[%s3191_s1 + $0x70] sm:$0xff]   ;;  %v2519_v56 = vld [vmem:[%s3191_s1 + $0x78] sm:$0xff]   ;;  %v2520_v60 = vld [vmem:[%s3191_s1] sm:$0xff]  }
   0x9   :  { %v79_v31 = vrot.slane %v77_v24, 7  ;;  %v88_v32 = vrot.slane %v86_v26, 7  ;;  %vm147_vm10 = vsmask.f32 7440  ;;  %vm2799_vm14 = vmor %vm434_vm12, %vm435_vm13  ;;  %vm763_vm0 = vcmask 64512   ;;  %v2549_v19 = vld [vmem:[%s3195_s2 + $0x10] sm:$0xff]  }
   0xa   :  { %v74_v35 = vor.u32 %v72_v23, %v71_v28  ;;  %v75_v36 = vrot.slane %v71_v28, 4  ;;  %v94_v41 = vshrl.u32 %v1976_v33, 16  ;;  %v97_v42 = vshll.u32 %v1976_v33, 16  ;;  %vm2729_vm11 = vmor %vm146_vm9, %vm147_vm10 }
   0xb   :  { %2122 = vmatpush3.bf16.msra.mxu0 %v2514_v3  ;;  %v82_v37 = vor.u32 %v80_v25, %v79_v31  ;;  %v84_v38 = vrot.slane %v79_v31, 4  ;;  %v91_v39 = vor.u32 %v89_v27, %v88_v32  ;;  %v92_v50 = vrot.slane %v88_v32, 4 }
   0xc   :  { %2123 = vmatprep.subr.bf16.mxu0 %v2515_v5  ;;  %v110_v45 = vld [vmem:[#allocation2] sm:$0xf]  ;;  %v117_v46 = vld [vmem:[#allocation2 + $0xc] sm:$0xf]  ;;  %v96_v51 = vrot.slane %v94_v41, 7 }
   0xd   :  { %v83_v44 = vsel %vm2678_vm7, %v75_v36, %v82_v37  ;;  %v111_v47 = vsel %vm2683_vm8, %v74_v35, %v110_v45  ;;  %v118_v49 = vsel %vm2683_vm8, %v91_v39, %v117_v46  ;;  %v599_v35 = vld [vmem:[%s3193_s7] sm:$0xff]  ;;  %v600_v37 = vld [vmem:[%s3193_s7 + $0x8] sm:$0xff] }
   0xe   :  { %113 = vst [vmem:[#allocation2 + $0x4] sm:$0xf] %v83_v44  ;;  %v114_v48 = vld [vmem:[#allocation2 + $0x8] sm:$0x1]  ;;  %112 = vst [vmem:[#allocation2] sm:$0xf] %v111_v47  ;;  %v99_v54 = vor.u32 %v97_v42, %v96_v51  ;;  %v2748_v41 = vpack.c.bf16 %v600_v37, %v599_v35 }
   0xf   :  { %2124 = vmatpush3.bf16.msra.mxu0 %v2515_v5  ;;  %v121_v52 = vld [vmem:[#allocation2 + $0x14] sm:$0x1]  ;;  %v115_v53 = vsel %vm2649_vm3, %v84_v38, %v114_v48  ;;  %119 = vst [vmem:[#allocation2 + $0xc] sm:$0xf] %v118_v49  ;;  %v101_v55 = vrot.slane %v96_v51, 4  ;;  %v2521_v47 = vld [vmem:[%s3191_s1 + $0x8] sm:$0xff]  }
  0x10   :  { %2125 = vmatprep.subr.bf16.mxu0 %v2516_v15  ;;  %116 = vst [vmem:[#allocation2 + $0x8] sm:$0x1] %v115_v53  ;;  %v100_v57 = vsel %vm2678_vm7, %v92_v50, %v99_v54  ;;  %v601_v42 = vld [vmem:[%s3193_s7 + $0x10] sm:$0xff]  ;;  %2399 = vmatpush3.bf16.msra.mxu1 %v2748_v41  ;;  %v603_v49 = vld [vmem:[%s3193_s7 + $0x20] sm:$0xff]  ;;  %v604_v50 = vld [vmem:[%s3193_s7 + $0x28] sm:$0xff] }
  0x11   :  { %v122_v58 = vsel %vm2649_vm3, %v101_v55, %v121_v52  ;;  %120 = vst [vmem:[#allocation2 + $0x10] sm:$0xf] %v100_v57  ;;  %2400 = vmatprep.subr.bf16.mxu1 %v2572_v2  ;;  %v2522_v51 = vld [vmem:[%s3191_s1 + $0x10] sm:$0xff]   ;;  %v2777_v52 = vpack.c.bf16 %v604_v50, %v603_v49  ;;  %v2523_v53 = vld [vmem:[%s3191_s1 + $0x18] sm:$0xff]   ;;  %v2524_v54 = vld [vmem:[%s3191_s1 + $0x20] sm:$0xff]  }
  0x12   :  { %123 = vst [vmem:[#allocation2 + $0x14] sm:$0x1] %v122_v58  ;;  %v2525_v55 = vld [vmem:[%s3191_s1 + $0x28] sm:$0xff]   ;;  %v613_v37 = vld [vmem:[%s3193_s7 + $0x70] sm:$0xff] }
  0x13   :  { %2126 = vmatpush3.bf16.msra.mxu0 %v2516_v15  ;;  %v612_v35 = vld [vmem:[%s3193_s7 + $0x68] sm:$0xff] }
  0x14   :  { %2127 = vmatprep.subr.bf16.mxu0 %v2517_v30 }
  0x15   :  { %v2705_v59 = vld [vmem:[#allocation2 + $0x4] sm:$0xf]  ;;  %v2710_v61 = vld [vmem:[#allocation2] sm:$0xf] }
  0x16   :  { %v159_v62 = vshll.u32 %v2705_v59, 16  ;;  %v163_v63 = vshrl.u32 %v2705_v59, 16  ;;  %v2714_v0 = vld [vmem:[#allocation2 + $0xc] sm:$0xf]  ;;  %v150_v3 = vshrl.u32 %v2710_v61, 16  ;;  %v153_v4 = vshll.u32 %v2710_v61, 16 }
  0x17   :  { %2128 = vmatpush3.bf16.msra.mxu0 %v2517_v30  ;;  %v2716_v1 = vld [vmem:[#allocation2 + $0x8] sm:$0x1]  ;;  %v174_v5 = vshrl.u32 %v2714_v0, 16  ;;  %v177_v6 = vshll.u32 %v2714_v0, 16  ;;  %v1861_v45 = vcombine.low %v2710_v61, %v2705_v59  ;;  %v439_v57 = vrot.slane %v2705_v59, 5  ;;  %v2529_v59 = vld [vmem:[%s3191_s1 + $0x80] sm:$0xff]  }
  0x18   :  { %2129 = vmatprep.subr.bf16.mxu0 %v2518_v43  ;;  %v161_v7 = vrot.slane %v159_v62, 5  ;;  %v165_v8 = vrot.slane %v163_v63, 4  ;;  %v169_v10 = vshll.u32 %v2716_v1, 16  ;;  %v152_v11 = vrot.slane %v150_v3, 4  ;;  %v2723_v17 = vld [vmem:[#allocation2 + $0x10] sm:$0xf] }
  0x19   :  { %v155_v12 = vrot.slane %v153_v4, 5  ;;  %v176_v13 = vrot.slane %v174_v5, 4  ;;  %v179_v14 = vrot.slane %v177_v6, 5  ;;  %v2725_v18 = vld [vmem:[#allocation2 + $0x14] sm:$0x1]  ;;  %v183_v22 = vshll.u32 %v2723_v17, 16 }
  0x1a   :  { %v166_v15 = vor.u32 %v165_v8, %v161_v7  ;;  %v171_v16 = vrot.slane %v169_v10, 5  ;;  %v187_v23 = vshrl.u32 %v2723_v17, 16  ;;  %v193_v25 = vshll.u32 %v2725_v18, 16  ;;  %v428_v58 = vld [vmem:[#allocation2] sm:$0xe]  ;;  %v2531_v8 = vld [vmem:[%s3191_s1 + $0x88] sm:$0xff]  }
  0x1b   :  { %2130 = vmatpush3.bf16.msra.mxu0 %v2518_v43  ;;  %v156_v20 = vor.u32 %v155_v12, %v152_v11  ;;  %v180_v21 = vor.u32 %v179_v14, %v176_v13  ;;  %v185_v28 = vrot.slane %v183_v22, 5  ;;  %v602_v43 = vld [vmem:[%s3193_s7 + $0x18] sm:$0xff]  ;;  %v1871_v62 = vrot.slane %v428_v58, 9  ;;  %v2532_v10 = vld [vmem:[%s3191_s1 + $0x90] sm:$0xff]   ;;  %v2534_v11 = vld [vmem:[%s3191_s1 + $0xa0] sm:$0xff]  }
  0x1c   :  { %2131 = vmatprep.subr.bf16.mxu0 %v2519_v56  ;;  %v167_v24 = vrot.slane %v166_v15, 4  ;;  %v189_v29 = vrot.slane %v187_v23, 4  ;;  %v195_v33 = vrot.slane %v193_v25, 5  ;;  %v2765_v48 = vpack.c.bf16 %v602_v43, %v601_v42  ;;  %v2535_v12 = vld [vmem:[%s3191_s1 + $0xa8] sm:$0xff]   ;;  %v2536_v14 = vld [vmem:[%s3191_s1 + $0xb0] sm:$0xff]   ;;  %v2537_v22 = vld [vmem:[%s3191_s1 + $0xb8] sm:$0xff]  }
  0x1d   :  { %v157_v26 = vrot.slane %v156_v20, 4  ;;  %v181_v27 = vrot.slane %v180_v21, 4  ;;  %v441_v63 = vrot.slane %v439_v57, 4  ;;  %v442_v3 = vrot.slane %v2716_v1, 5  ;;  %v429_v15 = vld [vmem:[#allocation2 + $0xc] sm:$0xe] }
  0x1e   :  { %v172_v30 = vsel %vm2729_vm11, %v167_v24, %v171_v16  ;;  %v190_v32 = vor.u32 %v189_v29, %v185_v28  ;;  %2402 = vmatpush3.bf16.msra.mxu1 %v2765_v48  ;;  %v440_v5 = vsel %vm2799_vm14, %v1871_v62, %v439_v57  ;;  %v446_v13 = vrot.slane %v2723_v17, 5  ;;  %v606_v25 = vld [vmem:[%s3193_s7 + $0x38] sm:$0xff] }
  0x1f   :  { %2132 = vmatpush3.bf16.msra.mxu0 %v2519_v56  ;;  %v162_v31 = vsel %vm2729_vm11, %v157_v26, %v161_v7  ;;  %v186_v38 = vsel %vm2729_vm11, %v181_v27, %v185_v28  ;;  %2403 = vmatprep.subr.bf16.mxu1 %v2572_v2  ;;  %v2526_v56 = vld [vmem:[%s3191_s1 + $0x30] sm:$0xff]   ;;  %v443_v6 = vsel %vm2799_vm14, %v441_v63, %v442_v3  ;;  %v1872_v16 = vrot.slane %v429_v15, 9  ;;  %v607_v27 = vld [vmem:[%s3193_s7 + $0x40] sm:$0xff]  ;;  %v608_v28 = vld [vmem:[%s3193_s7 + $0x48] sm:$0xff] }
  0x20   :  { %2137 = vmatprep.subr.bf16.mxu0 %v2520_v60  ;;  %v1851_v36 = vcombine.low %v162_v31, %v172_v30  ;;  %v191_v39 = vrot.slane %v190_v32, 4  ;;  %v1862_v7 = vcombine.low %v2714_v0, %v2723_v17  ;;  %v1889_v1 = vcombine.low %v440_v5, %v443_v6  ;;  %v2533_v0 = vld [vmem:[%s3191_s1 + $0x98] sm:$0xff]   ;;  %v609_v30 = vld [vmem:[%s3193_s7 + $0x50] sm:$0xff] }
  0x21   :  { %v448_v20 = vrot.slane %v446_v13, 4  ;;  %v449_v21 = vrot.slane %v2725_v18, 5  ;;  %v447_v17 = vsel %vm2799_vm14, %v1872_v16, %v446_v13  ;;  %v605_v18 = vld [vmem:[%s3193_s7 + $0x30] sm:$0xff]  ;;  %v2864_v29 = vpack.c.bf16 %v608_v28, %v607_v27  ;;  %v610_v31 = vld [vmem:[%s3193_s7 + $0x58] sm:$0xff]  ;;  %v2542_v28 = vld [vmem:[%s3195_s2 + $0x60] sm:$0xff]  }
  0x22   :  { %2133 = vmatprep.mubr.bf16.mxu0 %v1851_v36  ;;  %v196_v44 = vsel %vm2729_vm11, %v191_v39, %v195_v33  ;;  %2405 = vmatpush3.bf16.msra.mxu1 %v2777_v52  ;;  %v2852_v26 = vpack.c.bf16 %v606_v25, %v605_v18  ;;  %v2876_v32 = vpack.c.bf16 %v610_v31, %v609_v30  ;;  %v611_v33 = vld [vmem:[%s3193_s7 + $0x60] sm:$0xff]  ;;  %v2574_v39 = vmov 0.0   ;;  %v2539_v18 = vld [vmem:[%s3195_s2 + $0x48] sm:$0xff]   ;;  %v2540_v25 = vld [vmem:[%s3195_s2 + $0x50] sm:$0xff]  }
  0x23   :  { %v1852_v46 = vcombine.low %v186_v38, %v196_v44  ;;  %2406 = vmatprep.subr.bf16.mxu1 %v2572_v2  ;;  %v450_v23 = vsel %vm2799_vm14, %v448_v20, %v449_v21  ;;  %v2888_v36 = vpack.c.bf16 %v612_v35, %v611_v33  ;;  %v614_v38 = vld [vmem:[%s3193_s7 + $0x78] sm:$0xff]  ;;  %2209 = vmatprep.mubr.msk.f32.mxu1 %vm2573_vm15, %v2574_v39  ;;  %v2543_v30 = vld [vmem:[%s3195_s2 + $0x68] sm:$0xff]   ;;  %v2544_v31 = vld [vmem:[%s3195_s2 + $0x70] sm:$0xff]  }
  0x24   :  { %v1890_v24 = vcombine.low %v447_v17, %v450_v23  ;;  %v2901_v42 = vpack.c.bf16 %v614_v38, %v613_v37  ;;  %v2541_v27 = vld [vmem:[%s3195_s2 + $0x58] sm:$0xff]   ;;  %v2989_v35 = vld [vmem:[%s3195_s2] sm:$0xff]   ;;  %v910_v37 = vlaneseq }
  0x25   :  { %2134 = vmatmul.mubr.bf16.vlgmr.msra.gmra.mrb[0].mxu0 %v1852_v46  ;;  %v2545_v33 = vld [vmem:[%s3195_s2 + $0x78] sm:$0xff]  }
  0x26   :  { %2138 = vmatpush3.bf16.msra.mxu0 %v2520_v60  ;;  %2153 = vmatprep.mubr.bf16.mxu0 %v1861_v45  ;;  %v2527_v60 = vld [vmem:[%s3191_s1 + $0x38] sm:$0xff]   ;;  %v911_v38 = vshrl.u32 %v910_v37, 7 }
  0x27   :  { %2139 = vmatprep.subr.bf16.mxu0 %v2521_v47  ;;  %2408 = vmatpush3.bf16.msra.mxu1 %v2852_v26  ;;  %v2559_v4 = vld [vmem:[%s3195_s2 + $0x98] sm:$0xff]  }
  0x28   :  { %2409 = vmatprep.subr.bf16.mxu1 %v2572_v2 }
  0x2a   :  { %2140 = vmatpush3.bf16.msra.mxu0 %v2521_v47 }
  0x2b   :  { %2141 = vmatprep.subr.bf16.mxu0 %v2522_v51  ;;  %2411 = vmatpush3.bf16.msra.mxu1 %v2864_v29 }
  0x2c   :  { %2412 = vmatprep.subr.bf16.mxu1 %v2572_v2 }
  0x2e   :  { %2142 = vmatpush3.bf16.msra.mxu0 %v2522_v51 }
  0x2f   :  { %2143 = vmatprep.subr.bf16.mxu0 %v2523_v53  ;;  %2414 = vmatpush3.bf16.msra.mxu1 %v2876_v32 }
  0x30   :  { %2415 = vmatprep.subr.bf16.mxu1 %v2572_v2 }
  0x32   :  { %2144 = vmatpush3.bf16.msra.mxu0 %v2523_v53 }
  0x33   :  { %2145 = vmatprep.subr.bf16.mxu0 %v2524_v54  ;;  %2417 = vmatpush3.bf16.msra.mxu1 %v2888_v36 }
  0x34   :  { %2418 = vmatprep.subr.bf16.mxu1 %v2572_v2 }
  0x36   :  { %2146 = vmatpush3.bf16.msra.mxu0 %v2524_v54 }
  0x37   :  { %2147 = vmatprep.subr.bf16.mxu0 %v2525_v55  ;;  %2420 = vmatpush3.bf16.msra.mxu1 %v2901_v42 }
  0x38   :  { %2421 = vmatprep.subr.bf16.mxu1 %v2572_v2 }
  0x3a   :  { %2148 = vmatpush3.bf16.msra.mxu0 %v2525_v55 }
  0x3b   :  { %2149 = vmatprep.subr.bf16.mxu0 %v2526_v56 }
  0x3e   :  { %2150 = vmatpush3.bf16.msra.mxu0 %v2526_v56 }
  0x3f   :  { %2151 = vmatprep.subr.bf16.mxu0 %v2527_v60 }
  0x42   :  { %2152 = vmatpush3.bf16.msra.mxu0 %v2527_v60 }
  0x43   :  { %2157 = vmatprep.subr.bf16.mxu0 %v2529_v59 }
  0x45   :  { %2154 = vmatmul.mubr.bf16.vlgmr.msra.gmra.mrb[0].mxu0 %v1862_v7 }
  0x46   :  { %2158 = vmatpush3.bf16.msra.mxu0 %v2529_v59  ;;  %2173 = vmatprep.mubr.bf16.mxu0 %v1889_v1 }
  0x47   :  { %2159 = vmatprep.subr.bf16.mxu0 %v2531_v8 }
  0x4a   :  { %2160 = vmatpush3.bf16.msra.mxu0 %v2531_v8 }
  0x4b   :  { %2161 = vmatprep.subr.bf16.mxu0 %v2532_v10 }
  0x4e   :  { %2162 = vmatpush3.bf16.msra.mxu0 %v2532_v10 }
  0x4f   :  { %2163 = vmatprep.subr.bf16.mxu0 %v2533_v0 }
  0x52   :  { %2164 = vmatpush3.bf16.msra.mxu0 %v2533_v0 }
  0x53   :  { %2165 = vmatprep.subr.bf16.mxu0 %v2534_v11 }
  0x56   :  { %2166 = vmatpush3.bf16.msra.mxu0 %v2534_v11  ;;  %v2953_v11 = vld [vmem:[%s3194_s8] sm:$0xff] }
  0x57   :  { %2167 = vmatprep.subr.bf16.mxu0 %v2535_v12 }
  0x5a   :  { %2168 = vmatpush3.bf16.msra.mxu0 %v2535_v12 }
  0x5b   :  { %2169 = vmatprep.subr.bf16.mxu0 %v2536_v14 }
  0x5e   :  { %2170 = vmatpush3.bf16.msra.mxu0 %v2536_v14 }
  0x5f   :  { %2171 = vmatprep.subr.bf16.mxu0 %v2537_v22 }
  0x62   :  { %2172 = vmatpush3.bf16.msra.mxu0 %v2537_v22 }
  0x63   :  { %2445 = vmatprep.subr.bf16.mxu0 %v2572_v2 }
  0x65   :  { %2174 = vmatmul.mubr.bf16.vlgmr.msra.gmra.mrb[0].mxu0 %v1890_v24  ;;  %v2538_v24 = vld [vmem:[%s3195_s2 + $0x40] sm:$0xff]  }
  0x66   :  { %2447 = vmatpush3.bf16.msra.mxu0 %v2748_v41  ;;  %2349 = vmatprep.mubr.msk.f32.mxu0 %vm2573_vm15, %v2574_v39 }
  0x67   :  { %2448 = vmatprep.subr.bf16.mxu0 %v2572_v2 }
  0x6a   :  { %2450 = vmatpush3.bf16.msra.mxu0 %v2765_v48 }
  0x6b   :  { %2451 = vmatprep.subr.bf16.mxu0 %v2572_v2 }
  0x6e   :  { %2453 = vmatpush3.bf16.msra.mxu0 %v2777_v52 }
  0x6f   :  { %2454 = vmatprep.subr.bf16.mxu0 %v2572_v2 }
  0x72   :  { %2456 = vmatpush3.bf16.msra.mxu0 %v2852_v26 }
  0x73   :  { %2457 = vmatprep.subr.bf16.mxu0 %v2572_v2 }
  0x76   :  { %2459 = vmatpush3.bf16.msra.mxu0 %v2864_v29 }
  0x77   :  { %2460 = vmatprep.subr.bf16.mxu0 %v2572_v2 }
  0x7a   :  { %2462 = vmatpush3.bf16.msra.mxu0 %v2876_v32 }
  0x7b   :  { %2463 = vmatprep.subr.bf16.mxu0 %v2572_v2 }
  0x7e   :  { %2465 = vmatpush3.bf16.msra.mxu0 %v2888_v36 }
  0x7f   :  { %2466 = vmatprep.subr.bf16.mxu0 %v2572_v2 }
  0x82   :  { %2468 = vmatpush3.bf16.msra.mxu0 %v2901_v42 }
  0x83   :  { %2469 = vmatprep.subr.bf16.mxu0 %v2572_v2 }
 0x138   :  { %v2910_v43 = vpop.f32.mrb[0].mxu0 }
 0x139   :  { %v2912_v44 = vpop.f32.mrb[1].mxu0  ;;  %v588_v51 = vmul.f32 %v2910_v43, %v2910_v43 }
 0x13a   :  { %v2914_v45 = vpop.f32.mrb[2].mxu0  ;;  %v586_v47 = vmul.f32 %v2912_v44, %v2912_v44 }
 0x13b   :  { %v2916_v46 = vpop.f32.mrb[3].mxu0  ;;  %v589_v55 = vmul.f32 %v2914_v45, %v2914_v45 }
 0x13c   :  { %v577_v49 = vadd.f32 %v2916_v46, %v2912_v44  ;;  %v587_v50 = vmul.f32 %v2916_v46, %v2916_v46 }
 0x13e   :  { %v578_v53 = vadd.f32 %v2910_v43, %v577_v49  ;;  %v590_v54 = vadd.f32 %v587_v50, %v586_v47  ;;  %v2992_v47 = vsub.s32 0, %v911_v38 }
 0x140   :  { %v579_v56 = vadd.f32 %v2914_v45, %v578_v53  ;;  %v591_v57 = vadd.f32 %v590_v54, %v588_v51 }
 0x142   :  { %v580_v58 = vrot.slane %v579_v56, 4  ;;  %v592_v60 = vadd.f32 %v591_v57, %v589_v55  ;;  %v918_v57 = vld [vmem:[%s3196_s3] sm:$0x1] }
 0x144   :  { %v581_v62 = vadd.f32 %v580_v58, %v579_v56  ;;  %v593_v6 = vrot.slane %v592_v60, 4 }
 0x146   :  { %v582_v63 = vrot.slane %v581_v62, 2  ;;  %v594_v7 = vadd.f32 %v593_v6, %v592_v60 }
 0x148   :  { %v583_v3 = vadd.f32 %v582_v63, %v581_v62  ;;  %v595_v1 = vrot.slane %v594_v7, 2 }
 0x14a   :  { %v584_v59 = vrot.slane %v583_v3, 1  ;;  %v596_v8 = vadd.f32 %v595_v1, %v594_v7 }
 0x14c   :  { %v585_v5 = vadd.f32 %v584_v59, %v583_v3  ;;  %v597_v10 = vrot.slane %v596_v8, 1  ;;  %v1901_v3 = vld [vmem:[%s3197_s4] ss:$0 sm:$0xff] }
 0x14e   :  { %2210 = vmatmul.mubr.f32.vlgmr.msra.gmra.mrb[0].mxu1 %v585_v5  ;;  %v598_v0 = vadd.f32 %v597_v10, %v596_v8 }
 0x14f   :  { %2423 = vmatpush3.bf16.msra.mxu1 %v2748_v41  ;;  %2244 = vmatprep.mubr.msk.f32.mxu1 %vm2573_vm15, %v2574_v39 }
 0x150   :  { %2424 = vmatprep.subr.bf16.mxu1 %v2572_v2 }
 0x153   :  { %2426 = vmatpush3.bf16.msra.mxu1 %v2765_v48 }
 0x154   :  { %2427 = vmatprep.subr.bf16.mxu1 %v2572_v2 }
 0x157   :  { %2429 = vmatpush3.bf16.msra.mxu1 %v2777_v52 }
 0x158   :  { %2430 = vmatprep.subr.bf16.mxu1 %v2572_v2 }
 0x15b   :  { %2432 = vmatpush3.bf16.msra.mxu1 %v2852_v26 }
 0x15c   :  { %2433 = vmatprep.subr.bf16.mxu1 %v2572_v2 }
 0x15f   :  { %2435 = vmatpush3.bf16.msra.mxu1 %v2864_v29 }
 0x160   :  { %2436 = vmatprep.subr.bf16.mxu1 %v2572_v2 }
 0x163   :  { %2438 = vmatpush3.bf16.msra.mxu1 %v2876_v32 }
 0x164   :  { %2439 = vmatprep.subr.bf16.mxu1 %v2572_v2 }
 0x167   :  { %2441 = vmatpush3.bf16.msra.mxu1 %v2888_v36 }
 0x168   :  { %2442 = vmatprep.subr.bf16.mxu1 %v2572_v2 }
 0x16b   :  { %2444 = vmatpush3.bf16.msra.mxu1 %v2901_v42 }
 0x16c   :  { %2247 = vmatprep.subr.mxu1 %v2574_v39 }
 0x16e   :  { %2245 = vmatmul.mubr.f32.vlgmr.msra.gmra.mrb[2].mxu1 %v598_v0 }
 0x16f   :  { %2249 = vmatprep.mubr.msk.f32.mxu1 %vm2573_vm15, %v2574_v39  ;;  %2248 = vmatpush3.msra.mxu1 %v2953_v11 }
 0x170   :  { %2252 = vmatprep.subr.mxu1 %v2574_v39 }
 0x221   :  { %v681_v12 = vpop.f32.mrb[0].mxu1 }
 0x222   :  { %v756_v13 = vmul.f32 0.001953125, %v681_v12  ;;  %v2211_v14 = vpop.f32.mrb[1].mxu1 }
 0x224   :  { %2250 = vmatmul.mubr.msk.f32.vlgmr.msra.gmra.mrb[4].mxu1 %vm763_vm0, %v756_v13  ;;  %v758_v16 = vmul.f32 %v756_v13, %v756_v13 }
 0x225   :  { %2253 = vmatpush3.msra.mxu1 %v2953_v11  ;;  %2254 = vmatprep.mubr.msk.f32.mxu1 %vm2573_vm15, %v2574_v39 }
 0x226   :  { %2257 = vmatprep.subr.bf16.mxu1 %v2538_v24 }
 0x241   :  { %v751_v15 = vpop.f32.mrb[2].mxu1 }
 0x242   :  { %v757_v20 = vmul.f32 0.001953125, %v751_v15  ;;  %v2246_v21 = vpop.f32.mrb[3].mxu1 }
 0x244   :  { %v759_v22 = vsub.f32 %v757_v20, %v758_v16 }
 0x246   :  { %v760_v17 = vadd.f32 1e-05, %v759_v22 }
 0x248   :  { %2564 = vrsqrt.f32 %v760_v17 }
 0x252   :  { %v2565_v23 = vpop.eup %2564 }
 0x253   :  { %2255 = vmatmul.mubr.msk.f32.vlgmr.msra.gmra.mrb[6].mxu1 %vm763_vm0, %v2565_v23 }
 0x254   :  { %2258 = vmatpush3.bf16.msra.mxu1 %v2538_v24 }
 0x255   :  { %2259 = vmatprep.subr.bf16.mxu1 %v2539_v18 }
 0x258   :  { %2260 = vmatpush3.bf16.msra.mxu1 %v2539_v18 }
 0x259   :  { %2261 = vmatprep.subr.bf16.mxu1 %v2540_v25 }
 0x25c   :  { %2262 = vmatpush3.bf16.msra.mxu1 %v2540_v25 }
 0x25d   :  { %2263 = vmatprep.subr.bf16.mxu1 %v2541_v27 }
 0x260   :  { %2264 = vmatpush3.bf16.msra.mxu1 %v2541_v27 }
 0x261   :  { %2265 = vmatprep.subr.bf16.mxu1 %v2542_v28 }
 0x264   :  { %2266 = vmatpush3.bf16.msra.mxu1 %v2542_v28 }
 0x265   :  { %2267 = vmatprep.subr.bf16.mxu1 %v2543_v30 }
 0x268   :  { %2268 = vmatpush3.bf16.msra.mxu1 %v2543_v30 }
 0x269   :  { %2269 = vmatprep.subr.bf16.mxu1 %v2544_v31 }
 0x26c   :  { %2270 = vmatpush3.bf16.msra.mxu1 %v2544_v31  ;;  %v998_v31 = vld [vmem:[#allocation2 + $0x8] sm:$0x1] }
 0x26d   :  { %2271 = vmatprep.subr.bf16.mxu1 %v2545_v33 }
 0x270   :  { %2272 = vmatpush3.bf16.msra.mxu1 %v2545_v33 }
 0x271   :  { %2277 = vmatprep.subr.bf16.mxu1 %v2989_v35 }
 0x2f7   :  { %v833_v49 = vpop.f32.mrb[4].mxu1 }
 0x2f8   :  { %v913_v50 = vrot.slane %v833_v49, %v2992_v47  ;;  %v2251_v51 = vpop.f32.mrb[5].mxu1 }
 0x2f9   :  { %v1005_v51 = vld [vmem:[#allocation2 + $0x14] sm:$0x1] }
 0x2fa   :  { %v914_v53 = vsub.f32 %v2912_v44, %v913_v50  ;;  %v915_v54 = vsub.f32 %v2916_v46, %v913_v50  ;;  %v916_v55 = vsub.f32 %v2910_v43, %v913_v50  ;;  %v917_v56 = vsub.f32 %v2914_v45, %v913_v50  ;;  %v1001_v50 = vld [vmem:[#allocation2 + $0xc] sm:$0xf] }
 0x326   :  { %v906_v58 = vpop.f32.mrb[6].mxu1 }
 0x327   :  { %v919_v60 = vmul.f32 %v918_v57, %v906_v58  ;;  %v2256_v62 = vpop.f32.mrb[7].mxu1 }
 0x329   :  { %v923_v63 = vrot.slane %v919_v60, %v2992_v47 }
 0x32b   :  { %v924_v44 = vmul.f32 %v923_v63, %v914_v53  ;;  %v925_v59 = vmul.f32 %v923_v63, %v915_v54  ;;  %v926_v46 = vmul.f32 %v923_v63, %v916_v55  ;;  %v927_v5 = vmul.f32 %v923_v63, %v917_v56 }
 0x32d   :  { %v935_v43 = vadd.f32 %v1901_v3, %v924_v44  ;;  %v936_v6 = vadd.f32 %v1901_v3, %v925_v59  ;;  %v937_v45 = vadd.f32 %v1901_v3, %v926_v46  ;;  %v938_v7 = vadd.f32 %v1901_v3, %v927_v5 }
 0x32f   :  { %v939_v1 = vmax.f32 %v935_v43, 0.0  ;;  %v940_v8 = vmax.f32 %v936_v6, 0.0  ;;  %v941_v10 = vmax.f32 %v937_v45, 0.0  ;;  %v942_v0 = vmax.f32 %v938_v7, 0.0 }
 0x331   :  { %v1977_v12 = vpack.c.bf16 %v939_v1, %v939_v1  ;;  %v1978_v13 = vpack.c.bf16 %v940_v8, %v940_v8  ;;  %v1979_v14 = vpack.c.bf16 %v941_v10, %v941_v10  ;;  %v1980_v15 = vpack.c.bf16 %v942_v0, %v942_v0 }
 0x333   :  { %v956_v16 = vshrl.u32 %v1977_v12, 16  ;;  %v964_v20 = vshrl.u32 %v1978_v13, 16  ;;  %v973_v21 = vshrl.u32 %v1979_v14, 16  ;;  %v981_v22 = vshrl.u32 %v1980_v15, 16 }
 0x334   :  { %v959_v23 = vshll.u32 %v1977_v12, 16  ;;  %v967_v18 = vshll.u32 %v1978_v13, 16  ;;  %v976_v27 = vshll.u32 %v1979_v14, 16  ;;  %v984_v30 = vshll.u32 %v1980_v15, 16 }
 0x335   :  { %v958_v17 = vrot.slane %v956_v16, 7  ;;  %v966_v24 = vrot.slane %v964_v20, 7  ;;  %v975_v25 = vrot.slane %v973_v21, 7  ;;  %v983_v28 = vrot.slane %v981_v22, 7 }
 0x337   :  { %v961_v33 = vor.u32 %v959_v23, %v958_v17  ;;  %v962_v37 = vrot.slane %v958_v17, 4  ;;  %v969_v38 = vor.u32 %v967_v18, %v966_v24  ;;  %v971_v49 = vrot.slane %v966_v24, 4 }
 0x338   :  { %v978_v53 = vor.u32 %v976_v27, %v975_v25  ;;  %v979_v54 = vrot.slane %v975_v25, 4  ;;  %v986_v55 = vor.u32 %v984_v30, %v983_v28  ;;  %v988_v56 = vrot.slane %v983_v28, 4 }
 0x339   :  { %v970_v57 = vsel %vm2678_vm7, %v962_v37, %v969_v38  ;;  %v995_v58 = vsel %vm2683_vm8, %v961_v33, %v2710_v61  ;;  %v999_v60 = vsel %vm2649_vm3, %v971_v49, %v998_v31 }
 0x33a   :  { %v987_v62 = vsel %vm2678_vm7, %v979_v54, %v986_v55  ;;  %996 = vst [vmem:[#allocation2] sm:$0xf] %v995_v58  ;;  %997 = vst [vmem:[#allocation2 + $0x4] sm:$0xf] %v970_v57  ;;  %v1002_v63 = vsel %vm2683_vm8, %v978_v53, %v1001_v50  ;;  %v1006_v3 = vsel %vm2649_vm3, %v988_v56, %v1005_v51 }
 0x33b   :  { %1000 = vst [vmem:[#allocation2 + $0x8] sm:$0x1] %v999_v60  ;;  %1003 = vst [vmem:[#allocation2 + $0xc] sm:$0xf] %v1002_v63  ;;  %v2548_v63 = vld [vmem:[%s3195_s2 + $0x8] sm:$0xff]  }
 0x33c   :  { %1004 = vst [vmem:[#allocation2 + $0x10] sm:$0xf] %v987_v62  ;;  %1007 = vst [vmem:[#allocation2 + $0x14] sm:$0x1] %v1006_v3 }
 0x341   :  { %v1008_v44 = vld [vmem:[#allocation2] sm:$0xf]  ;;  %v3019_v61 = vld [vmem:[#allocation2 + $0x4] sm:$0xf] }
 0x342   :  { %v3021_v59 = vld [vmem:[#allocation2 + $0x8] sm:$0x1]  ;;  %v1031_v46 = vshrl.u32 %v1008_v44, 16  ;;  %v1034_v34 = vshll.u32 %v1008_v44, 16  ;;  %v1040_v5 = vshll.u32 %v3019_v61, 16  ;;  %v1044_v43 = vshrl.u32 %v3019_v61, 16 }
 0x343   :  { %v3025_v6 = vld [vmem:[#allocation2 + $0xc] sm:$0xf]  ;;  %v1050_v40 = vshll.u32 %v3021_v59, 16  ;;  %v3028_v9 = vld [vmem:[#allocation2 + $0x10] sm:$0xf] }
 0x344   :  { %v1055_v45 = vshrl.u32 %v3025_v6, 16  ;;  %v1033_v7 = vrot.slane %v1031_v46, 4  ;;  %v1036_v1 = vrot.slane %v1034_v34, 5  ;;  %v1042_v8 = vrot.slane %v1040_v5, 5  ;;  %v1029_v0 = vld [vmem:[#allocation2 + $0x14] sm:$0x1] }
 0x345   :  { %v1046_v10 = vrot.slane %v1044_v43, 4  ;;  %v1058_v13 = vshll.u32 %v3025_v6, 16  ;;  %v1064_v14 = vshll.u32 %v3028_v9, 16  ;;  %v1068_v20 = vshrl.u32 %v3028_v9, 16  ;;  %v1310_v21 = vld [vmem:[#allocation2 + $0xc] sm:$0xe] }
 0x346   :  { %v1057_v12 = vrot.slane %v1055_v45, 4  ;;  %v1037_v15 = vor.u32 %v1036_v1, %v1033_v7  ;;  %v1052_v22 = vrot.slane %v1050_v40, 5  ;;  %v1074_v27 = vshll.u32 %v1029_v0, 16  ;;  %v2550_v34 = vld [vmem:[%s3195_s2 + $0x18] sm:$0xff]   ;;  %v2553_v5 = vld [vmem:[%s3195_s2 + $0x30] sm:$0xff]   ;;  %v2556_v1 = vld [vmem:[%s3195_s2 + $0x80] sm:$0xff]  }
 0x347   :  { %v1047_v16 = vor.u32 %v1046_v10, %v1042_v8  ;;  %v1060_v17 = vrot.slane %v1058_v13, 5  ;;  %v1066_v23 = vrot.slane %v1064_v14, 5  ;;  %v1070_v25 = vrot.slane %v1068_v20, 4  ;;  %v2554_v40 = vld [vmem:[%s3195_s2 + $0x38] sm:$0xff]   ;;  %v1309_v45 = vld [vmem:[#allocation2] sm:$0xe] }
 0x348   :  { %v1038_v24 = vrot.slane %v1037_v15, 4  ;;  %v1943_v30 = vrot.slane %v1310_v21, 9  ;;  %v1324_v38 = vrot.slane %v3028_v9, 5  ;;  %v1076_v53 = vrot.slane %v1074_v27, 5  ;;  %v2557_v13 = vld [vmem:[%s3195_s2 + $0x88] sm:$0xff]   ;;  %v2562_v15 = vld [vmem:[%s3195_s2 + $0xb0] sm:$0xff]  }
 0x349   :  { %v1048_v18 = vrot.slane %v1047_v16, 4  ;;  %v1061_v28 = vor.u32 %v1060_v17, %v1057_v12  ;;  %v1071_v37 = vor.u32 %v1070_v25, %v1066_v23  ;;  %v1327_v55 = vrot.slane %v1029_v0, 5  ;;  %v2563_v16 = vld [vmem:[%s3195_s2 + $0xb8] sm:$0xff]  }
 0x34a   :  { %v1043_v31 = vsel %vm2729_vm11, %v1038_v24, %v1042_v8  ;;  %v1326_v54 = vrot.slane %v1324_v38, 4  ;;  %v3045_v58 = vsel %vm2799_vm14, %v1943_v30, %v1324_v38  ;;  %v1932_v46 = vcombine.low %v1008_v44, %v3019_v61  ;;  %v2551_v44 = vld [vmem:[%s3195_s2 + $0x20] sm:$0xff]  }
 0x34b   :  { %v1053_v33 = vsel %vm2729_vm11, %v1048_v18, %v1052_v22  ;;  %v1062_v50 = vrot.slane %v1061_v28, 4  ;;  %v1072_v51 = vrot.slane %v1071_v37, 4  ;;  %v1317_v43 = vrot.slane %v3019_v61, 5 }
 0x34c   :  { %v1922_v49 = vcombine.low %v1043_v31, %v1053_v33  ;;  %v3049_v60 = vsel %vm2799_vm14, %v1326_v54, %v1327_v55  ;;  %v1942_v8 = vrot.slane %v1309_v45, 9  ;;  %v1320_v10 = vrot.slane %v3021_v59, 5  ;;  %v2558_v59 = vld [vmem:[%s3195_s2 + $0x90] sm:$0xff]  }
 0x34d   :  { %v1067_v56 = vsel %vm2729_vm11, %v1062_v50, %v1066_v23  ;;  %v1077_v57 = vsel %vm2729_vm11, %v1072_v51, %v1076_v53  ;;  %v1961_v3 = vcombine.low %v3045_v58, %v3049_v60  ;;  %v1319_v7 = vrot.slane %v1317_v43, 4 }
 0x34e   :  { %2273 = vmatprep.mubr.bf16.mxu1 %v1922_v49  ;;  %v1923_v62 = vcombine.low %v1067_v56, %v1077_v57  ;;  %v1933_v0 = vcombine.low %v3025_v6, %v3028_v9  ;;  %v1318_v12 = vsel %vm2799_vm14, %v1942_v8, %v1317_v43  ;;  %v2560_v6 = vld [vmem:[%s3195_s2 + $0xa0] sm:$0xff]   ;;  %v2561_v9 = vld [vmem:[%s3195_s2 + $0xa8] sm:$0xff]  }
 0x34f   :  { %v1321_v61 = vsel %vm2799_vm14, %v1319_v7, %v1320_v10  ;;  %v1972_v7 = vld [vmem:[%s3199_s6] ss:$0 sm:$0xff] }
 0x350   :  { %2274 = vmatmul.mubr.bf16.vlgmr.msra.gmra.mrb[8].mxu1 %v1923_v62  ;;  %v1960_v14 = vcombine.low %v1318_v12, %v1321_v61 }
 0x351   :  { %2278 = vmatpush3.bf16.msra.mxu1 %v2989_v35  ;;  %2293 = vmatprep.mubr.bf16.mxu1 %v1932_v46  ;;  %v2552_v35 = vld [vmem:[%s3195_s2 + $0x28] sm:$0xff]  }
 0x352   :  { %2279 = vmatprep.subr.bf16.mxu1 %v2548_v63 }
 0x355   :  { %2280 = vmatpush3.bf16.msra.mxu1 %v2548_v63 }
 0x356   :  { %2281 = vmatprep.subr.bf16.mxu1 %v2549_v19 }
 0x359   :  { %2282 = vmatpush3.bf16.msra.mxu1 %v2549_v19 }
 0x35a   :  { %2283 = vmatprep.subr.bf16.mxu1 %v2550_v34 }
 0x35d   :  { %2284 = vmatpush3.bf16.msra.mxu1 %v2550_v34 }
 0x35e   :  { %2285 = vmatprep.subr.bf16.mxu1 %v2551_v44 }
 0x361   :  { %2286 = vmatpush3.bf16.msra.mxu1 %v2551_v44 }
 0x362   :  { %2287 = vmatprep.subr.bf16.mxu1 %v2552_v35 }
 0x365   :  { %2288 = vmatpush3.bf16.msra.mxu1 %v2552_v35  ;;  %v1794_v35 = vld [vmem:[%s3198_s5] sm:$0x1] }
 0x366   :  { %2289 = vmatprep.subr.bf16.mxu1 %v2553_v5 }
 0x369   :  { %2290 = vmatpush3.bf16.msra.mxu1 %v2553_v5 }
 0x36a   :  { %2291 = vmatprep.subr.bf16.mxu1 %v2554_v40 }
 0x36d   :  { %2292 = vmatpush3.bf16.msra.mxu1 %v2554_v40 }
 0x36e   :  { %2297 = vmatprep.subr.bf16.mxu1 %v2556_v1 }
 0x370   :  { %2294 = vmatmul.mubr.bf16.vlgmr.msra.gmra.mrb[8].mxu1 %v1933_v0 }
 0x371   :  { %2298 = vmatpush3.bf16.msra.mxu1 %v2556_v1  ;;  %2313 = vmatprep.mubr.bf16.mxu1 %v1960_v14 }
 0x372   :  { %2299 = vmatprep.subr.bf16.mxu1 %v2557_v13 }
 0x375   :  { %2300 = vmatpush3.bf16.msra.mxu1 %v2557_v13 }
 0x376   :  { %2301 = vmatprep.subr.bf16.mxu1 %v2558_v59 }
 0x379   :  { %2302 = vmatpush3.bf16.msra.mxu1 %v2558_v59  ;;  %v2568_v59 = vld [vmem:[%s3192_s0] sm:$0xff] }
 0x37a   :  { %2303 = vmatprep.subr.bf16.mxu1 %v2559_v4 }
 0x37d   :  { %2304 = vmatpush3.bf16.msra.mxu1 %v2559_v4 }
 0x37e   :  { %2305 = vmatprep.subr.bf16.mxu1 %v2560_v6 }
 0x381   :  { %2306 = vmatpush3.bf16.msra.mxu1 %v2560_v6 }
 0x382   :  { %2307 = vmatprep.subr.bf16.mxu1 %v2561_v9 }
 0x385   :  { %2308 = vmatpush3.bf16.msra.mxu1 %v2561_v9  ;;  %v2570_v9 = vld [vmem:[%s3192_s0 + $0x10] sm:$0xff] }
 0x386   :  { %2309 = vmatprep.subr.bf16.mxu1 %v2562_v15 }
 0x389   :  { %2310 = vmatpush3.bf16.msra.mxu1 %v2562_v15 }
 0x38a   :  { %2311 = vmatprep.subr.bf16.mxu1 %v2563_v16 }
 0x38d   :  { %2312 = vmatpush3.bf16.msra.mxu1 %v2563_v16  ;;  %v2571_v16 = vld [vmem:[%s3192_s0 + $0x18] sm:$0xff] }
 0x390   :  { %2314 = vmatmul.mubr.bf16.vlgmr.msra.gmra.mrb[8].mxu1 %v1961_v3 }
 0x463   :  { %v3108_v20 = vpop.f32.mrb[8].mxu1 }
 0x464   :  { %v3110_v21 = vpop.f32.mrb[9].mxu1  ;;  %v1466_v25 = vmul.f32 %v3108_v20, %v3108_v20 }
 0x465   :  { %v3112_v22 = vpop.f32.mrb[10].mxu1  ;;  %v1464_v23 = vmul.f32 %v3110_v21, %v3110_v21 }
 0x466   :  { %v3114_v17 = vpop.f32.mrb[11].mxu1  ;;  %v1467_v30 = vmul.f32 %v3112_v22, %v3112_v22 }
 0x467   :  { %v1455_v24 = vadd.f32 %v3114_v17, %v3110_v21  ;;  %v1465_v18 = vmul.f32 %v3114_v17, %v3114_v17 }
 0x469   :  { %v1456_v27 = vadd.f32 %v3108_v20, %v1455_v24  ;;  %v1468_v28 = vadd.f32 %v1465_v18, %v1464_v23 }
 0x46b   :  { %v1457_v31 = vadd.f32 %v3112_v22, %v1456_v27  ;;  %v1469_v33 = vadd.f32 %v1468_v28, %v1466_v25 }
 0x46d   :  { %v1458_v37 = vrot.slane %v1457_v31, 4  ;;  %v1470_v38 = vadd.f32 %v1469_v33, %v1467_v30 }
 0x46f   :  { %v1459_v49 = vadd.f32 %v1458_v37, %v1457_v31  ;;  %v1471_v55 = vrot.slane %v1470_v38, 4 }
 0x471   :  { %v1460_v50 = vrot.slane %v1459_v49, 2  ;;  %v1472_v56 = vadd.f32 %v1471_v55, %v1470_v38 }
 0x473   :  { %v1461_v51 = vadd.f32 %v1460_v50, %v1459_v49 }
 0x475   :  { %v1462_v53 = vrot.slane %v1461_v51, 1 }
 0x477   :  { %v1463_v54 = vadd.f32 %v1462_v53, %v1461_v51 }
 0x479   :  { %2350 = vmatmul.mubr.f32.vlgmr.msra.gmra.mrb[4].mxu0 %v1463_v54 }
 0x47a   :  { %2471 = vmatpush3.bf16.msra.mxu0 %v2748_v41  ;;  %2384 = vmatprep.mubr.msk.f32.mxu0 %vm2573_vm15, %v2574_v39  ;;  %v1473_v41 = vrot.slane %v1472_v56, 2 }
 0x47b   :  { %2472 = vmatprep.subr.bf16.mxu0 %v2572_v2 }
 0x47e   :  { %2474 = vmatpush3.bf16.msra.mxu0 %v2765_v48  ;;  %v1474_v48 = vadd.f32 %v1473_v41, %v1472_v56 }
 0x47f   :  { %2475 = vmatprep.subr.bf16.mxu0 %v2572_v2 }
 0x482   :  { %2477 = vmatpush3.bf16.msra.mxu0 %v2777_v52  ;;  %v1475_v52 = vrot.slane %v1474_v48, 1 }
 0x483   :  { %2478 = vmatprep.subr.bf16.mxu0 %v2572_v2 }
 0x486   :  { %2480 = vmatpush3.bf16.msra.mxu0 %v2852_v26  ;;  %v1476_v26 = vadd.f32 %v1475_v52, %v1474_v48 }
 0x487   :  { %2481 = vmatprep.subr.bf16.mxu0 %v2572_v2 }
 0x48a   :  { %2483 = vmatpush3.bf16.msra.mxu0 %v2864_v29 }
 0x48b   :  { %2484 = vmatprep.subr.bf16.mxu0 %v2572_v2 }
 0x48e   :  { %2486 = vmatpush3.bf16.msra.mxu0 %v2876_v32 }
 0x48f   :  { %2487 = vmatprep.subr.bf16.mxu0 %v2572_v2 }
 0x492   :  { %2489 = vmatpush3.bf16.msra.mxu0 %v2888_v36 }
 0x493   :  { %2490 = vmatprep.subr.bf16.mxu0 %v2572_v2 }
 0x496   :  { %2492 = vmatpush3.bf16.msra.mxu0 %v2901_v42 }
 0x497   :  { %2387 = vmatprep.subr.mxu0 %v2574_v39 }
 0x499   :  { %2385 = vmatmul.mubr.f32.vlgmr.msra.gmra.mrb[6].mxu0 %v1476_v26 }
 0x49a   :  { %2388 = vmatpush3.msra.mxu0 %v2953_v11  ;;  %2389 = vmatprep.mubr.msk.f32.mxu0 %vm2573_vm15, %v2574_v39 }
 0x49b   :  { %2392 = vmatprep.subr.mxu0 %v2574_v39 }
 0x54c   :  { %v1559_v29 = vpop.f32.mrb[4].mxu0 }
 0x54d   :  { %v1633_v32 = vmul.f32 0.001953125, %v1559_v29  ;;  %v2351_v57 = vpop.f32.mrb[5].mxu0 }
 0x54f   :  { %2390 = vmatmul.mubr.msk.f32.vlgmr.msra.gmra.mrb[8].mxu0 %vm763_vm0, %v1633_v32  ;;  %v1635_v36 = vmul.f32 %v1633_v32, %v1633_v32 }
 0x550   :  { %2393 = vmatpush3.msra.mxu0 %v2953_v11  ;;  %2394 = vmatprep.mubr.msk.f32.mxu0 %vm2573_vm15, %v2574_v39 }
 0x56c   :  { %v1629_v2 = vpop.f32.mrb[6].mxu0 }
 0x56d   :  { %v1634_v42 = vmul.f32 0.001953125, %v1629_v2  ;;  %v2386_v58 = vpop.f32.mrb[7].mxu0 }
 0x56f   :  { %v1636_v60 = vsub.f32 %v1634_v42, %v1635_v36 }
 0x571   :  { %v1637_v62 = vadd.f32 1e-05, %v1636_v60 }
 0x573   :  { %2566 = vrsqrt.f32 %v1637_v62 }
 0x57d   :  { %v2567_v63 = vpop.eup %2566 }
 0x57e   :  { %2395 = vmatmul.mubr.msk.f32.vlgmr.msra.gmra.mrb[10].mxu0 %vm763_vm0, %v2567_v63 }
 0x622   :  { %v1709_v3 = vpop.f32.mrb[8].mxu0 }
 0x623   :  { %v1789_v46 = vrot.slane %v1709_v3, %v2992_v47  ;;  %v2391_v19 = vpop.f32.mrb[9].mxu0 }
 0x625   :  { %v1790_v34 = vsub.f32 %v3110_v21, %v1789_v46  ;;  %v1791_v11 = vsub.f32 %v3114_v17, %v1789_v46  ;;  %v1792_v39 = vsub.f32 %v3108_v20, %v1789_v46  ;;  %v1793_v44 = vsub.f32 %v3112_v22, %v1789_v46 }
 0x651   :  { %v1782_v5 = vpop.f32.mrb[10].mxu0 }
 0x652   :  { %v1795_v43 = vmul.f32 %v1794_v35, %v1782_v5  ;;  %v2396_v40 = vpop.f32.mrb[11].mxu0 }
 0x654   :  { %v1799_v45 = vrot.slane %v1795_v43, %v2992_v47  ;;  %v2569_v47 = vld [vmem:[%s3192_s0 + $0x8] sm:$0xff] }
 0x656   :  { %v1800_v1 = vmul.f32 %v1799_v45, %v1790_v34  ;;  %v1801_v8 = vmul.f32 %v1799_v45, %v1791_v11  ;;  %v1802_v10 = vmul.f32 %v1799_v45, %v1792_v39  ;;  %v1803_v61 = vmul.f32 %v1799_v45, %v1793_v44 }
 0x658   :  { %v1811_v0 = vadd.f32 %v1972_v7, %v1800_v1  ;;  %v1812_v12 = vadd.f32 %v1972_v7, %v1801_v8  ;;  %v1813_v13 = vadd.f32 %v1972_v7, %v1802_v10  ;;  %v1814_v14 = vadd.f32 %v1972_v7, %v1803_v61 }
 0x65a   :  { %v1815_v4 = vadd.f32 %v2568_v59, %v1811_v0  ;;  %v1816_v6 = vadd.f32 %v2569_v47, %v1812_v12  ;;  %v1817_v15 = vadd.f32 %v2570_v9, %v1813_v13  ;;  %v1818_v20 = vadd.f32 %v2571_v16, %v1814_v14 }
 0x65c   :  { %v1819_v21 = vmax.f32 %v1815_v4, 0.0  ;;  %v1820_v22 = vmax.f32 %v1816_v6, 0.0  ;;  %v1821_v17 = vmax.f32 %v1817_v15, 0.0  ;;  %v1822_v23 = vmax.f32 %v1818_v20, 0.0 }
 0x65e   :  { %1823 = vst [vmem:[%s3200_s9] sm:$0xff] %v1819_v21  ;;  %1824 = vst [vmem:[%s3200_s9 + $0x8] sm:$0xff] %v1820_v22 }
 0x65f   :  { %1825 = vst [vmem:[%s3200_s9 + $0x10] sm:$0xff] %v1821_v17  ;;  %1826 = vst [vmem:[%s3200_s9 + $0x18] sm:$0xff] %v1822_v23 }

</bundles_post_ra>
